<compile_context>
chip_gen: v7x
topology: tpu7x:2x2x1
jax: 0.10.0
libtpu: 0.0.40
codegen_flags: <defaults>
</compile_context>

<pallas_src>
import functools

import jax
import jax.numpy as jnp
import numpy as np
from jax.experimental import pallas as pl
from jax.experimental.pallas import tpu as pltpu

LN_EPS = 1e-5  # torch nn.LayerNorm default


def _ln_hat(x):
    """LayerNorm without affine params: (x - mean) * rsqrt(var + eps)."""
    mu = jnp.mean(x, axis=-1, keepdims=True)
    var = jnp.mean(jnp.square(x - mu), axis=-1, keepdims=True)
    return (x - mu) * jax.lax.rsqrt(var + LN_EPS)


def _ln(x, scale, offset):
    return _ln_hat(x) * scale + offset


# ----------------------------- Pallas kernels ------------------------------ #

def _block_body(z, wqkv, bqkv, wo, bo, w1, b1, w2, b2, *, num_heads, key_size):
    """One transformer block on a (RB, S, D) tile (attention over axis -2, batched
    over axis -3).  All pre-LN scale/offsets are already folded into the weights."""
    RB, S, D = z.shape
    RS = RB * S
    HK = num_heads * key_size
    bf16 = jnp.bfloat16

    z2 = z.reshape(RS, D)

    # ---- multi-head attention: shared LN stats + single wide QKV matmul ----
    zhat = _ln_hat(z2)                                            # f32
    qkv = jnp.dot(zhat.astype(bf16), wqkv,
                  preferred_element_type=jnp.float32) + bqkv      # (RS, 3*HK) f32
    q = qkv[:, :HK].astype(bf16).reshape(RB, S, HK)
    k = qkv[:, HK:2 * HK].astype(bf16).reshape(RB, S, HK)
    v = qkv[:, 2 * HK:].astype(bf16).reshape(RB, S, HK)

    inv_scale = 1.0 / np.sqrt(float(key_size))
    heads = []
    for h in range(num_heads):                                    # static head loop
        sl = slice(h * key_size, (h + 1) * key_size)
        logits = jnp.einsum('rsk,rtk->rst', q[..., sl], k[..., sl],
                            preferred_element_type=jnp.float32) * inv_scale
        logits = logits - jnp.max(logits, axis=-1, keepdims=True)
        p = jnp.exp(logits)
        wgt = p * pl.reciprocal(jnp.sum(p, axis=-1, keepdims=True), approx=True)
        heads.append(jnp.einsum('rst,rtk->rsk', wgt.astype(bf16), v[..., sl],
                                preferred_element_type=jnp.float32))
    # one wide output projection over all heads (instead of H skinny K-wide dots)
    ctx = jnp.concatenate(heads, axis=-1).reshape(RS, HK)
    z2 = z2 + jnp.dot(ctx.astype(bf16), wo,
                      preferred_element_type=jnp.float32) + bo    # residual

    # ---- FFN (pre-LN folded into w1 / b1) ----
    h1 = jnp.maximum(jnp.dot(_ln_hat(z2).astype(bf16), w1,
                             preferred_element_type=jnp.float32) + b1, 0.0)
    z2 = z2 + jnp.dot(h1.astype(bf16), w2,
                      preferred_element_type=jnp.float32) + b2    # residual
    return z2.reshape(RB, S, D)


def block_kernel(z_ref, wqkv_ref, bqkv_ref, wo_ref, bo_ref,
                 w1_ref, b1_ref, w2_ref, b2_ref, o_ref, *, num_heads, key_size):
    o_ref[...] = _block_body(
        z_ref[...], wqkv_ref[...], bqkv_ref[...], wo_ref[...], bo_ref[...],
        w1_ref[...], b1_ref[...], w2_ref[...], b2_ref[...],
        num_heads=num_heads, key_size=key_size)


def embed_block_kernel(x_ref, wemb_ref, bemb_ref, wqkv_ref, bqkv_ref, wo_ref, bo_ref,
                       w1_ref, b1_ref, w2_ref, b2_ref, o_ref, *, num_heads, key_size):
    # Fused input embedding (Linear(2, D)) + first transformer block.
    x = x_ref[...]                                    # (RB, S, 2)
    w = wemb_ref[...]                                 # (2, D)
    z = x[..., 0:1] * w[0] + x[..., 1:2] * w[1] + bemb_ref[0]
    o_ref[...] = _block_body(
        z, wqkv_ref[...], bqkv_ref[...], wo_ref[...], bo_ref[...],
        w1_ref[...], b1_ref[...], w2_ref[...], b2_ref[...],
        num_heads=num_heads, key_size=key_size)


def head_kernel(z_ref, ln1_ref, wuv_ref, buv_ref, temp_ref, bias_ref, o_ref):
    # z: (R, S, D) -> edge logits (S, S)
    z = z_ref[...]
    ln1 = ln1_ref[...]
    z = _ln_hat(z) * ln1[0] + ln1[1]
    z = jnp.max(z, axis=0)                            # torch.max(z, dim=-3)
    D = z.shape[-1]

    zhat = _ln_hat(z)                                 # shared stats for LN_u and LN_v
    uv = jnp.dot(zhat.astype(jnp.bfloat16), wuv_ref[...],
                 preferred_element_type=jnp.float32) + buv_ref[...]   # (S, 2D)
    u = uv[:, :D]
    v = uv[:, D:]
    u = u * jax.lax.rsqrt(jnp.sum(u * u, axis=-1, keepdims=True))
    v = v * jax.lax.rsqrt(jnp.sum(v * v, axis=-1, keepdims=True))

    logits = jnp.einsum('sd,td->st', u.astype(jnp.bfloat16), v.astype(jnp.bfloat16),
                        preferred_element_type=jnp.float32)
    scale = jnp.exp(jnp.full((1, 1), temp_ref[0, 0], jnp.float32))    # exp(temp)
    o_ref[...] = logits * scale + bias_ref[0, 0]


# ------------------------------ wrapper / glue ------------------------------ #

_VMEM = pl.BlockSpec(memory_space=pltpu.MemorySpace.VMEM)
_SMEM = pl.BlockSpec(memory_space=pltpu.MemorySpace.SMEM)

_BLOCK_CP = pltpu.CompilerParams(
    dimension_semantics=("parallel",),
    vmem_limit_bytes=32 * 1024 * 1024,
)


def _fixed(a):
    nd = a.ndim
    return pl.BlockSpec(a.shape, lambda i, _n=nd: (0,) * _n)


def _leading_block(n):
    # >= 2 grid steps when possible: real megacore parallelism + input pipelining.
    return n // 2 if (n % 2 == 0 and n > 1) else n


def prepare_params(params):
    """Fold LayerNorm scale/offset into the following linear layers (w' = s[:,None]*W,
    b' = b + o @ W) and pre-cast the big matmul weights to bfloat16 (MXU-native).
    Biases and the pre-max head LN stay float32."""
    bf16 = jnp.bfloat16
    fp = {'w_emb': params['w_emb'], 'b_emb': params['b_emb']}

    blocks = []
    for bp in params['blocks']:
        ln = bp['ln']                               # (8, D): [sq,oq,sk,ok,sv,ov,sf,of]
        wqkv, bqkv = bp['wqkv'], bp['bqkv']         # (3, D, HK), (3, HK)
        ws, bs = [], []
        for i in range(3):
            s, o = ln[2 * i], ln[2 * i + 1]
            ws.append(s[:, None] * wqkv[i])
            bs.append(bqkv[i] + o @ wqkv[i])
        wqkv_f = jnp.concatenate(ws, axis=1).astype(bf16)          # (D, 3*HK)
        bqkv_f = jnp.concatenate(bs, axis=0)[None, :]              # (1, 3*HK) f32
        w1_f = (ln[6][:, None] * bp['w1']).astype(bf16)            # (D, hid)
        b1_f = (bp['b1'][0] + ln[7] @ bp['w1'])[None, :]           # (1, hid) f32
        blocks.append((wqkv_f, bqkv_f,
                       bp['wo'].astype(bf16), bp['bo'],
                       w1_f, b1_f,
                       bp['w2'].astype(bf16), bp['b2']))
    fp['blocks'] = blocks

    wu_f = params['lnu'][0][:, None] * params['wu']
    bu_f = params['bu'][0] + params['lnu'][1] @ params['wu']
    wv_f = params['lnv'][0][:, None] * params['wv']
    bv_f = params['bv'][0] + params['lnv'][1] @ params['wv']
    fp['ln1'] = params['ln1']
    fp['wuv'] = jnp.concatenate([wu_f, wv_f], axis=1).astype(bf16)  # (D, 2D)
    fp['buv'] = jnp.concatenate([bu_f, bv_f], axis=0)[None, :]      # (1, 2D) f32
    fp['temp'] = params['temp']
    fp['bias'] = params['bias']
    return fp


def base_model_forward(x, fparams, *, num_heads, key_size):
    R, S, _ = x.shape
    D = fparams['w_emb'].shape[1]
    blocks = fparams['blocks']
    assert len(blocks) % 2 == 0, "BaseModel requires an even number of blocks"

    # ---- block 0, fused with the (2 -> D) input embedding ----
    RB = _leading_block(R)
    z = pl.pallas_call(
        functools.partial(embed_block_kernel, num_heads=num_heads, key_size=key_size),
        out_shape=jax.ShapeDtypeStruct((R, S, D), jnp.float32),
        grid=(R // RB,),
        in_specs=[pl.BlockSpec((RB, S, 2), lambda i: (i, 0, 0)),
                  _fixed(fparams['w_emb']), _fixed(fparams['b_emb'])]
                 + [_fixed(w) for w in blocks[0]],
        out_specs=pl.BlockSpec((RB, S, D), lambda i: (i, 0, 0)),
        compiler_params=_BLOCK_CP,
    )(x, fparams['w_emb'], fparams['b_emb'], *blocks[0])
    z = jnp.swapaxes(z, -3, -2)                       # torch.swapaxes(z, -3, -2)

    # ---- remaining blocks ----
    kern = functools.partial(block_kernel, num_heads=num_heads, key_size=key_size)
    for bw in blocks[1:]:
        A, B_, _ = z.shape
        AB = _leading_block(A)
        z = pl.pallas_call(
            kern,
            out_shape=jax.ShapeDtypeStruct((A, B_, D), jnp.float32),
            grid=(A // AB,),
            in_specs=[pl.BlockSpec((AB, B_, D), lambda i: (i, 0, 0))]
                     + [_fixed(w) for w in bw],
            out_specs=pl.BlockSpec((AB, B_, D), lambda i: (i, 0, 0)),
            compiler_params=_BLOCK_CP,
        )(z, *bw)
        z = jnp.swapaxes(z, -3, -2)

    # ---- edge-probability head ----
    logits = pl.pallas_call(
        head_kernel,
        out_shape=jax.ShapeDtypeStruct((S, S), jnp.float32),
        in_specs=[_VMEM, _VMEM, _VMEM, _VMEM, _SMEM, _SMEM],
        out_specs=_VMEM,
        compiler_params=pltpu.CompilerParams(vmem_limit_bytes=32 * 1024 * 1024),
    )(z, fparams['ln1'], fparams['wuv'], fparams['buv'],
      fparams['temp'], fparams['bias'])
    return logits


# --------------------------- deterministic params --------------------------- #

def make_params(key, num_blocks, dim, num_heads, key_size, widening):
    HK = num_heads * key_size
    hid = widening * dim

    def lin(k, fi, fo):
        kw, kb = jax.random.split(k)
        w = jax.random.normal(kw, (fi, fo), jnp.float32) * (1.0 / np.sqrt(fi))
        b = jax.random.normal(kb, (1, fo), jnp.float32) * 0.02
        return w, b

    keys = jax.random.split(key, 2 + num_blocks)
    params = {}
    params['w_emb'], params['b_emb'] = lin(keys[0], 2, dim)

    blocks = []
    for i in range(num_blocks):
        bk = jax.random.split(keys[2 + i], 8)
        scales = 1.0 + 0.1 * jax.random.normal(bk[6], (4, dim), jnp.float32)
        offs = 0.1 * jax.random.normal(bk[7], (4, dim), jnp.float32)
        ln = jnp.stack([scales[0], offs[0], scales[1], offs[1],
                        scales[2], offs[2], scales[3], offs[3]])
        wq, bq = lin(bk[0], dim, HK)
        wk, bk_ = lin(bk[1], dim, HK)
        wv, bv = lin(bk[2], dim, HK)
        wo, bo = lin(bk[3], HK, dim)
        w1, b1 = lin(bk[4], dim, hid)
        w2, b2 = lin(bk[5], hid, dim)
        blocks.append(dict(ln=ln,
                           wqkv=jnp.stack([wq, wk, wv]),
                           bqkv=jnp.concatenate([bq, bk_, bv], axis=0),
                           wo=wo, bo=bo, w1=w1, b1=b1, w2=w2, b2=b2))
    params['blocks'] = blocks

    hk = jax.random.split(keys[1], 5)

    def ln_pair(k):
        s = 1.0 + 0.1 * jax.random.normal(k, (2, dim), jnp.float32)
        return jnp.stack([s[0], 0.1 * s[1]])

    params['ln1'] = ln_pair(hk[0])
    params['lnu'] = ln_pair(hk[1])
    params['lnv'] = ln_pair(hk[2])
    params['wu'], params['bu'] = lin(hk[3], dim, dim)
    params['wv'], params['bv'] = lin(hk[4], dim, dim)
    params['temp'] = jnp.zeros((1, 1), jnp.float32)           # cosine_temp_init = 0.0
    params['bias'] = jnp.full((1, 1), -3.0, jnp.float32)      # logit_bias_init = -3.0
    return params


# ---------------------------- pure-JAX reference ---------------------------- #

def ref_forward(x, params, *, num_heads, key_size):
    w = params['w_emb']
    z = x[..., 0:1] * w[0] + x[..., 1:2] * w[1] + params['b_emb'][0]
    for bp in params['blocks']:
        lnp = bp['ln']
        q = _ln(z, lnp[0], lnp[1]) @ bp['wqkv'][0] + bp['bqkv'][0]
        k = _ln(z, lnp[2], lnp[3]) @ bp['wqkv'][1] + bp['bqkv'][1]
        v = _ln(z, lnp[4], lnp[5]) @ bp['wqkv'][2] + bp['bqkv'][2]
        attn = jnp.zeros(z.shape, jnp.float32)
        for h in range(num_heads):
            sl = slice(h * key_size, (h + 1) * key_size)
            qh, kh, vh = q[..., sl], k[..., sl], v[..., sl]
            lg = jnp.einsum('rsk,rtk->rst', qh, kh) / np.sqrt(float(key_size))
            wgt = jax.nn.softmax(lg, axis=-1)
            attn = attn + jnp.einsum('rst,rtk->rsk', wgt, vh) @ bp['wo'][sl, :]
        z = z + attn + bp['bo'][0]
        zin = _ln(z, lnp[6], lnp[7])
        h1 = jnp.maximum(zin @ bp['w1'] + bp['b1'][0], 0.0)
        z = z + h1 @ bp['w2'] + bp['b2'][0]
        z = jnp.swapaxes(z, -3, -2)
    z = _ln(z, params['ln1'][0], params['ln1'][1])
    z = jnp.max(z, axis=-3)
    u = _ln(z, params['lnu'][0], params['lnu'][1]) @ params['wu'] + params['bu'][0]
    v = _ln(z, params['lnv'][0], params['lnv'][1]) @ params['wv'] + params['bv'][0]
    u = u / jnp.linalg.norm(u, axis=-1, keepdims=True)
    v = v / jnp.linalg.norm(v, axis=-1, keepdims=True)
    logits = jnp.einsum('id,jd->ij', u, v)
    return logits * jnp.exp(params['temp'][0, 0]) + params['bias'][0, 0]


if __name__ == "__main__":
    # Small config: 2 transformer blocks (even), dim=32, 4 heads x key 8, widening 4.
    R, S = 8, 8                       # observations, variables
    dim, heads, ksz, widening = 32, 4, 8, 4
    n_blocks = 2

    key = jax.random.PRNGKey(0)
    kx, kp = jax.random.split(key)
    x = jax.random.normal(kx, (R, S, 2), jnp.float32)
    params = make_params(kp, n_blocks, dim, heads, ksz, widening)
    fparams = prepare_params(params)

    out = base_model_forward(x, fparams, num_heads=heads, key_size=ksz)
    out = jax.block_until_ready(out)

    ref = ref_forward(x, params, num_heads=heads, key_size=ksz)
    assert out.shape == (S, S)
    # bf16 MXU operands (f32 accumulation) in the kernel vs. pure-f32 reference.
    np.testing.assert_allclose(np.asarray(out), np.asarray(ref), atol=3e-2, rtol=3e-2)
    print("KERNEL_OK")
</pallas_src>

<mosaic_0001>
module attributes {stable_mosaic.version = 11 : i64} {
  func.func @embed_block_kernel(%arg0: i32, %arg1: memref<4x8x2xf32, #tpu.memory_space<vmem>>, %arg2: memref<2x32xf32, #tpu.memory_space<vmem>>, %arg3: memref<1x32xf32, #tpu.memory_space<vmem>>, %arg4: memref<32x96xbf16, #tpu.memory_space<vmem>>, %arg5: memref<1x96xf32, #tpu.memory_space<vmem>>, %arg6: memref<32x32xbf16, #tpu.memory_space<vmem>>, %arg7: memref<1x32xf32, #tpu.memory_space<vmem>>, %arg8: memref<32x128xbf16, #tpu.memory_space<vmem>>, %arg9: memref<1x128xf32, #tpu.memory_space<vmem>>, %arg10: memref<128x32xbf16, #tpu.memory_space<vmem>>, %arg11: memref<1x32xf32, #tpu.memory_space<vmem>>, %arg12: memref<4x8x32xf32, #tpu.memory_space<vmem>>) attributes {dimension_semantics = [#tpu.dimension_semantics<parallel>], iteration_bounds = array<i64: 2>, scalar_prefetch = 0 : i64, scratch_operands = 0 : i64, tpu.core_type = #tpu.core_type<tc>, window_params = [{transform_indices = @transform_0, window_bounds = array<i64: 4, 8, 2>}, {pipeline_mode = #tpu.pipeline_mode<synchronous>, transform_indices = @transform_1, window_bounds = array<i64: 2, 32>}, {pipeline_mode = #tpu.pipeline_mode<synchronous>, transform_indices = @transform_2, window_bounds = array<i64: 1, 32>}, {pipeline_mode = #tpu.pipeline_mode<synchronous>, transform_indices = @transform_3, window_bounds = array<i64: 32, 96>}, {pipeline_mode = #tpu.pipeline_mode<synchronous>, transform_indices = @transform_4, window_bounds = array<i64: 1, 96>}, {pipeline_mode = #tpu.pipeline_mode<synchronous>, transform_indices = @transform_5, window_bounds = array<i64: 32, 32>}, {pipeline_mode = #tpu.pipeline_mode<synchronous>, transform_indices = @transform_6, window_bounds = array<i64: 1, 32>}, {pipeline_mode = #tpu.pipeline_mode<synchronous>, transform_indices = @transform_7, window_bounds = array<i64: 32, 128>}, {pipeline_mode = #tpu.pipeline_mode<synchronous>, transform_indices = @transform_8, window_bounds = array<i64: 1, 128>}, {pipeline_mode = #tpu.pipeline_mode<synchronous>, transform_indices = @transform_9, window_bounds = array<i64: 128, 32>}, {pipeline_mode = #tpu.pipeline_mode<synchronous>, transform_indices = @transform_10, window_bounds = array<i64: 1, 32>}, {transform_indices = @transform_11, window_bounds = array<i64: 4, 8, 32>}]} {
    %c0 = arith.constant 0 : index
    %c0_0 = arith.constant 0 : index
    %c0_1 = arith.constant 0 : index
    %0 = vector.load %arg1[%c0, %c0_0, %c0_1] : memref<4x8x2xf32, #tpu.memory_space<vmem>>, vector<4x8x2xf32>
    %c0_2 = arith.constant 0 : index
    %c0_3 = arith.constant 0 : index
    %1 = vector.load %arg2[%c0_2, %c0_3] : memref<2x32xf32, #tpu.memory_space<vmem>>, vector<2x32xf32>
    %2 = vector.extract_strided_slice %0 {offsets = [0, 0, 0], sizes = [4, 8, 1], strides = [1, 1, 1]} : vector<4x8x2xf32> to vector<4x8x1xf32>
    %3 = vector.extract_strided_slice %1 {offsets = [0, 0], sizes = [1, 32], strides = [1, 1]} : vector<2x32xf32> to vector<1x32xf32>
    %4 = vector.shape_cast %3 : vector<1x32xf32> to vector<32xf32>
    %5 = vector.shape_cast %4 : vector<32xf32> to vector<1x1x32xf32>
    %6 = vector.broadcast %2 : vector<4x8x1xf32> to vector<4x8x32xf32>
    %7 = vector.broadcast %5 : vector<1x1x32xf32> to vector<4x8x32xf32>
    %8 = arith.mulf %6, %7 : vector<4x8x32xf32>
    %9 = vector.extract_strided_slice %0 {offsets = [0, 0, 1], sizes = [4, 8, 1], strides = [1, 1, 1]} : vector<4x8x2xf32> to vector<4x8x1xf32>
    %10 = vector.extract_strided_slice %1 {offsets = [1, 0], sizes = [1, 32], strides = [1, 1]} : vector<2x32xf32> to vector<1x32xf32>
    %11 = vector.shape_cast %10 : vector<1x32xf32> to vector<32xf32>
    %12 = vector.shape_cast %11 : vector<32xf32> to vector<1x1x32xf32>
    %13 = vector.broadcast %9 : vector<4x8x1xf32> to vector<4x8x32xf32>
    %14 = vector.broadcast %12 : vector<1x1x32xf32> to vector<4x8x32xf32>
    %15 = arith.mulf %13, %14 : vector<4x8x32xf32>
    %16 = arith.addf %8, %15 : vector<4x8x32xf32>
    %c0_4 = arith.constant 0 : index
    %c0_5 = arith.constant 0 : index
    %17 = vector.load %arg3[%c0_4, %c0_5] : memref<1x32xf32, #tpu.memory_space<vmem>>, vector<1x32xf32>
    %18 = vector.shape_cast %17 : vector<1x32xf32> to vector<32xf32>
    %19 = vector.shape_cast %18 : vector<32xf32> to vector<1x1x32xf32>
    %20 = vector.broadcast %19 : vector<1x1x32xf32> to vector<4x8x32xf32>
    %21 = arith.addf %16, %20 : vector<4x8x32xf32>
    %c0_6 = arith.constant 0 : index
    %c0_7 = arith.constant 0 : index
    %22 = vector.load %arg4[%c0_6, %c0_7] : memref<32x96xbf16, #tpu.memory_space<vmem>>, vector<32x96xbf16>
    %c0_8 = arith.constant 0 : index
    %c0_9 = arith.constant 0 : index
    %23 = vector.load %arg5[%c0_8, %c0_9] : memref<1x96xf32, #tpu.memory_space<vmem>>, vector<1x96xf32>
    %c0_10 = arith.constant 0 : index
    %c0_11 = arith.constant 0 : index
    %24 = vector.load %arg6[%c0_10, %c0_11] : memref<32x32xbf16, #tpu.memory_space<vmem>>, vector<32x32xbf16>
    %c0_12 = arith.constant 0 : index
    %c0_13 = arith.constant 0 : index
    %25 = vector.load %arg7[%c0_12, %c0_13] : memref<1x32xf32, #tpu.memory_space<vmem>>, vector<1x32xf32>
    %c0_14 = arith.constant 0 : index
    %c0_15 = arith.constant 0 : index
    %26 = vector.load %arg8[%c0_14, %c0_15] : memref<32x128xbf16, #tpu.memory_space<vmem>>, vector<32x128xbf16>
    %c0_16 = arith.constant 0 : index
    %c0_17 = arith.constant 0 : index
    %27 = vector.load %arg9[%c0_16, %c0_17] : memref<1x128xf32, #tpu.memory_space<vmem>>, vector<1x128xf32>
    %c0_18 = arith.constant 0 : index
    %c0_19 = arith.constant 0 : index
    %28 = vector.load %arg10[%c0_18, %c0_19] : memref<128x32xbf16, #tpu.memory_space<vmem>>, vector<128x32xbf16>
    %c0_20 = arith.constant 0 : index
    %c0_21 = arith.constant 0 : index
    %29 = vector.load %arg11[%c0_20, %c0_21] : memref<1x32xf32, #tpu.memory_space<vmem>>, vector<1x32xf32>
    %30 = vector.shape_cast %21 : vector<4x8x32xf32> to vector<32x32xf32>
    %cst = arith.constant dense<0.000000e+00> : vector<32xf32>
    %31 = vector.multi_reduction <add>, %30, %cst [1] : vector<32x32xf32> to vector<32xf32>
    %32 = vector.shape_cast %31 : vector<32xf32> to vector<32x1xf32>
    %cst_22 = arith.constant 3.200000e+01 : f32
    %33 = vector.broadcast %cst_22 : f32 to vector<32x1xf32>
    %34 = arith.divf %32, %33 : vector<32x1xf32>
    %35 = vector.broadcast %34 : vector<32x1xf32> to vector<32x32xf32>
    %36 = arith.subf %30, %35 : vector<32x32xf32>
    %37 = arith.mulf %36, %36 : vector<32x32xf32>
    %cst_23 = arith.constant dense<0.000000e+00> : vector<32xf32>
    %38 = vector.multi_reduction <add>, %37, %cst_23 [1] : vector<32x32xf32> to vector<32xf32>
    %39 = vector.shape_cast %38 : vector<32xf32> to vector<32x1xf32>
    %cst_24 = arith.constant 3.200000e+01 : f32
    %40 = vector.broadcast %cst_24 : f32 to vector<32x1xf32>
    %41 = arith.divf %39, %40 : vector<32x1xf32>
    %42 = vector.broadcast %34 : vector<32x1xf32> to vector<32x32xf32>
    %43 = arith.subf %30, %42 : vector<32x32xf32>
    %cst_25 = arith.constant 9.99999974E-6 : f32
    %44 = vector.broadcast %cst_25 : f32 to vector<32x1xf32>
    %45 = arith.addf %41, %44 : vector<32x1xf32>
    %46 = math.rsqrt %45 : vector<32x1xf32>
    %47 = vector.broadcast %46 : vector<32x1xf32> to vector<32x32xf32>
    %48 = arith.mulf %43, %47 : vector<32x32xf32>
    %49 = arith.truncf %48 : vector<32x32xf32> to vector<32x32xbf16>
    %cst_26 = arith.constant dense<0.000000e+00> : vector<32x96xf32>
    %50 = tpu.matmul %49, %22, %cst_26 {dimension_numbers = #tpu.dot_dimension_numbers<[1], [0], [0], [1], [0, 0, 1, 1], [], []>} : vector<32x32xbf16>, vector<32x96xbf16>, vector<32x96xf32> -> vector<32x96xf32>
    %51 = vector.broadcast %23 : vector<1x96xf32> to vector<32x96xf32>
    %52 = arith.addf %50, %51 : vector<32x96xf32>
    %53 = vector.extract_strided_slice %52 {offsets = [0, 0], sizes = [32, 32], strides = [1, 1]} : vector<32x96xf32> to vector<32x32xf32>
    %54 = arith.truncf %53 : vector<32x32xf32> to vector<32x32xbf16>
    %55 = vector.shape_cast %54 : vector<32x32xbf16> to vector<4x8x32xbf16>
    %56 = vector.extract_strided_slice %52 {offsets = [0, 32], sizes = [32, 32], strides = [1, 1]} : vector<32x96xf32> to vector<32x32xf32>
    %57 = arith.truncf %56 : vector<32x32xf32> to vector<32x32xbf16>
    %58 = vector.shape_cast %57 : vector<32x32xbf16> to vector<4x8x32xbf16>
    %59 = vector.extract_strided_slice %52 {offsets = [0, 64], sizes = [32, 32], strides = [1, 1]} : vector<32x96xf32> to vector<32x32xf32>
    %60 = arith.truncf %59 : vector<32x32xf32> to vector<32x32xbf16>
    %61 = vector.shape_cast %60 : vector<32x32xbf16> to vector<4x8x32xbf16>
    %62 = vector.extract_strided_slice %55 {offsets = [0, 0, 0], sizes = [4, 8, 8], strides = [1, 1, 1]} : vector<4x8x32xbf16> to vector<4x8x8xbf16>
    %63 = vector.extract_strided_slice %58 {offsets = [0, 0, 0], sizes = [4, 8, 8], strides = [1, 1, 1]} : vector<4x8x32xbf16> to vector<4x8x8xbf16>
    "tpu.trace_start"() <{level = 10 : i32, message = "rsk,rtk->rst"}> : () -> ()
    %cst_27 = arith.constant dense<0.000000e+00> : vector<4x8x8xf32>
    %64 = tpu.matmul %62, %63, %cst_27 {dimension_numbers = #tpu.dot_dimension_numbers<[2], [2], [1], [1], [0, 0, 0, 1, 1, 1], [0], [0]>} : vector<4x8x8xbf16>, vector<4x8x8xbf16>, vector<4x8x8xf32> -> vector<4x8x8xf32>
    "tpu.trace_stop"() : () -> ()
    %cst_28 = arith.constant 0.353553385 : f32
    %65 = vector.broadcast %cst_28 : f32 to vector<4x8x8xf32>
    %66 = arith.mulf %64, %65 : vector<4x8x8xf32>
    %cst_29 = arith.constant dense<0xFF800000> : vector<4x8xf32>
    %67 = vector.multi_reduction <maximumf>, %66, %cst_29 [2] : vector<4x8x8xf32> to vector<4x8xf32>
    %68 = vector.shape_cast %67 : vector<4x8xf32> to vector<4x8x1xf32>
    %69 = vector.broadcast %68 : vector<4x8x1xf32> to vector<4x8x8xf32>
    %70 = arith.subf %66, %69 : vector<4x8x8xf32>
    %71 = math.exp %70 : vector<4x8x8xf32>
    %cst_30 = arith.constant dense<0.000000e+00> : vector<4x8xf32>
    %72 = vector.multi_reduction <add>, %71, %cst_30 [2] : vector<4x8x8xf32> to vector<4x8xf32>
    %73 = vector.shape_cast %72 : vector<4x8xf32> to vector<4x8x1xf32>
    %74 = tpu.reciprocal %73 {approx = true} : vector<4x8x1xf32> -> vector<4x8x1xf32>
    %75 = vector.broadcast %74 : vector<4x8x1xf32> to vector<4x8x8xf32>
    %76 = arith.mulf %71, %75 : vector<4x8x8xf32>
    %77 = arith.truncf %76 : vector<4x8x8xf32> to vector<4x8x8xbf16>
    %78 = vector.extract_strided_slice %61 {offsets = [0, 0, 0], sizes = [4, 8, 8], strides = [1, 1, 1]} : vector<4x8x32xbf16> to vector<4x8x8xbf16>
    "tpu.trace_start"() <{level = 10 : i32, message = "rst,rtk->rsk"}> : () -> ()
    %cst_31 = arith.constant dense<0.000000e+00> : vector<4x8x8xf32>
    %79 = tpu.matmul %77, %78, %cst_31 {dimension_numbers = #tpu.dot_dimension_numbers<[2], [1], [1], [2], [0, 0, 0, 1, 1, 2], [0], [0]>} : vector<4x8x8xbf16>, vector<4x8x8xbf16>, vector<4x8x8xf32> -> vector<4x8x8xf32>
    "tpu.trace_stop"() : () -> ()
    %80 = vector.extract_strided_slice %55 {offsets = [0, 0, 8], sizes = [4, 8, 8], strides = [1, 1, 1]} : vector<4x8x32xbf16> to vector<4x8x8xbf16>
    %81 = vector.extract_strided_slice %58 {offsets = [0, 0, 8], sizes = [4, 8, 8], strides = [1, 1, 1]} : vector<4x8x32xbf16> to vector<4x8x8xbf16>
    "tpu.trace_start"() <{level = 10 : i32, message = "rsk,rtk->rst"}> : () -> ()
    %cst_32 = arith.constant dense<0.000000e+00> : vector<4x8x8xf32>
    %82 = tpu.matmul %80, %81, %cst_32 {dimension_numbers = #tpu.dot_dimension_numbers<[2], [2], [1], [1], [0, 0, 0, 1, 1, 1], [0], [0]>} : vector<4x8x8xbf16>, vector<4x8x8xbf16>, vector<4x8x8xf32> -> vector<4x8x8xf32>
    "tpu.trace_stop"() : () -> ()
    %cst_33 = arith.constant 0.353553385 : f32
    %83 = vector.broadcast %cst_33 : f32 to vector<4x8x8xf32>
    %84 = arith.mulf %82, %83 : vector<4x8x8xf32>
    %cst_34 = arith.constant dense<0xFF800000> : vector<4x8xf32>
    %85 = vector.multi_reduction <maximumf>, %84, %cst_34 [2] : vector<4x8x8xf32> to vector<4x8xf32>
    %86 = vector.shape_cast %85 : vector<4x8xf32> to vector<4x8x1xf32>
    %87 = vector.broadcast %86 : vector<4x8x1xf32> to vector<4x8x8xf32>
    %88 = arith.subf %84, %87 : vector<4x8x8xf32>
    %89 = math.exp %88 : vector<4x8x8xf32>
    %cst_35 = arith.constant dense<0.000000e+00> : vector<4x8xf32>
    %90 = vector.multi_reduction <add>, %89, %cst_35 [2] : vector<4x8x8xf32> to vector<4x8xf32>
    %91 = vector.shape_cast %90 : vector<4x8xf32> to vector<4x8x1xf32>
    %92 = tpu.reciprocal %91 {approx = true} : vector<4x8x1xf32> -> vector<4x8x1xf32>
    %93 = vector.broadcast %92 : vector<4x8x1xf32> to vector<4x8x8xf32>
    %94 = arith.mulf %89, %93 : vector<4x8x8xf32>
    %95 = arith.truncf %94 : vector<4x8x8xf32> to vector<4x8x8xbf16>
    %96 = vector.extract_strided_slice %61 {offsets = [0, 0, 8], sizes = [4, 8, 8], strides = [1, 1, 1]} : vector<4x8x32xbf16> to vector<4x8x8xbf16>
    "tpu.trace_start"() <{level = 10 : i32, message = "rst,rtk->rsk"}> : () -> ()
    %cst_36 = arith.constant dense<0.000000e+00> : vector<4x8x8xf32>
    %97 = tpu.matmul %95, %96, %cst_36 {dimension_numbers = #tpu.dot_dimension_numbers<[2], [1], [1], [2], [0, 0, 0, 1, 1, 2], [0], [0]>} : vector<4x8x8xbf16>, vector<4x8x8xbf16>, vector<4x8x8xf32> -> vector<4x8x8xf32>
    "tpu.trace_stop"() : () -> ()
    %98 = vector.extract_strided_slice %55 {offsets = [0, 0, 16], sizes = [4, 8, 8], strides = [1, 1, 1]} : vector<4x8x32xbf16> to vector<4x8x8xbf16>
    %99 = vector.extract_strided_slice %58 {offsets = [0, 0, 16], sizes = [4, 8, 8], strides = [1, 1, 1]} : vector<4x8x32xbf16> to vector<4x8x8xbf16>
    "tpu.trace_start"() <{level = 10 : i32, message = "rsk,rtk->rst"}> : () -> ()
    %cst_37 = arith.constant dense<0.000000e+00> : vector<4x8x8xf32>
    %100 = tpu.matmul %98, %99, %cst_37 {dimension_numbers = #tpu.dot_dimension_numbers<[2], [2], [1], [1], [0, 0, 0, 1, 1, 1], [0], [0]>} : vector<4x8x8xbf16>, vector<4x8x8xbf16>, vector<4x8x8xf32> -> vector<4x8x8xf32>
    "tpu.trace_stop"() : () -> ()
    %cst_38 = arith.constant 0.353553385 : f32
    %101 = vector.broadcast %cst_38 : f32 to vector<4x8x8xf32>
    %102 = arith.mulf %100, %101 : vector<4x8x8xf32>
    %cst_39 = arith.constant dense<0xFF800000> : vector<4x8xf32>
    %103 = vector.multi_reduction <maximumf>, %102, %cst_39 [2] : vector<4x8x8xf32> to vector<4x8xf32>
    %104 = vector.shape_cast %103 : vector<4x8xf32> to vector<4x8x1xf32>
    %105 = vector.broadcast %104 : vector<4x8x1xf32> to vector<4x8x8xf32>
    %106 = arith.subf %102, %105 : vector<4x8x8xf32>
    %107 = math.exp %106 : vector<4x8x8xf32>
    %cst_40 = arith.constant dense<0.000000e+00> : vector<4x8xf32>
    %108 = vector.multi_reduction <add>, %107, %cst_40 [2] : vector<4x8x8xf32> to vector<4x8xf32>
    %109 = vector.shape_cast %108 : vector<4x8xf32> to vector<4x8x1xf32>
    %110 = tpu.reciprocal %109 {approx = true} : vector<4x8x1xf32> -> vector<4x8x1xf32>
    %111 = vector.broadcast %110 : vector<4x8x1xf32> to vector<4x8x8xf32>
    %112 = arith.mulf %107, %111 : vector<4x8x8xf32>
    %113 = arith.truncf %112 : vector<4x8x8xf32> to vector<4x8x8xbf16>
    %114 = vector.extract_strided_slice %61 {offsets = [0, 0, 16], sizes = [4, 8, 8], strides = [1, 1, 1]} : vector<4x8x32xbf16> to vector<4x8x8xbf16>
    "tpu.trace_start"() <{level = 10 : i32, message = "rst,rtk->rsk"}> : () -> ()
    %cst_41 = arith.constant dense<0.000000e+00> : vector<4x8x8xf32>
    %115 = tpu.matmul %113, %114, %cst_41 {dimension_numbers = #tpu.dot_dimension_numbers<[2], [1], [1], [2], [0, 0, 0, 1, 1, 2], [0], [0]>} : vector<4x8x8xbf16>, vector<4x8x8xbf16>, vector<4x8x8xf32> -> vector<4x8x8xf32>
    "tpu.trace_stop"() : () -> ()
    %116 = vector.extract_strided_slice %55 {offsets = [0, 0, 24], sizes = [4, 8, 8], strides = [1, 1, 1]} : vector<4x8x32xbf16> to vector<4x8x8xbf16>
    %117 = vector.extract_strided_slice %58 {offsets = [0, 0, 24], sizes = [4, 8, 8], strides = [1, 1, 1]} : vector<4x8x32xbf16> to vector<4x8x8xbf16>
    "tpu.trace_start"() <{level = 10 : i32, message = "rsk,rtk->rst"}> : () -> ()
    %cst_42 = arith.constant dense<0.000000e+00> : vector<4x8x8xf32>
    %118 = tpu.matmul %116, %117, %cst_42 {dimension_numbers = #tpu.dot_dimension_numbers<[2], [2], [1], [1], [0, 0, 0, 1, 1, 1], [0], [0]>} : vector<4x8x8xbf16>, vector<4x8x8xbf16>, vector<4x8x8xf32> -> vector<4x8x8xf32>
    "tpu.trace_stop"() : () -> ()
    %cst_43 = arith.constant 0.353553385 : f32
    %119 = vector.broadcast %cst_43 : f32 to vector<4x8x8xf32>
    %120 = arith.mulf %118, %119 : vector<4x8x8xf32>
    %cst_44 = arith.constant dense<0xFF800000> : vector<4x8xf32>
    %121 = vector.multi_reduction <maximumf>, %120, %cst_44 [2] : vector<4x8x8xf32> to vector<4x8xf32>
    %122 = vector.shape_cast %121 : vector<4x8xf32> to vector<4x8x1xf32>
    %123 = vector.broadcast %122 : vector<4x8x1xf32> to vector<4x8x8xf32>
    %124 = arith.subf %120, %123 : vector<4x8x8xf32>
    %125 = math.exp %124 : vector<4x8x8xf32>
    %cst_45 = arith.constant dense<0.000000e+00> : vector<4x8xf32>
    %126 = vector.multi_reduction <add>, %125, %cst_45 [2] : vector<4x8x8xf32> to vector<4x8xf32>
    %127 = vector.shape_cast %126 : vector<4x8xf32> to vector<4x8x1xf32>
    %128 = tpu.reciprocal %127 {approx = true} : vector<4x8x1xf32> -> vector<4x8x1xf32>
    %129 = vector.broadcast %128 : vector<4x8x1xf32> to vector<4x8x8xf32>
    %130 = arith.mulf %125, %129 : vector<4x8x8xf32>
    %131 = arith.truncf %130 : vector<4x8x8xf32> to vector<4x8x8xbf16>
    %132 = vector.extract_strided_slice %61 {offsets = [0, 0, 24], sizes = [4, 8, 8], strides = [1, 1, 1]} : vector<4x8x32xbf16> to vector<4x8x8xbf16>
    "tpu.trace_start"() <{level = 10 : i32, message = "rst,rtk->rsk"}> : () -> ()
    %cst_46 = arith.constant dense<0.000000e+00> : vector<4x8x8xf32>
    %133 = tpu.matmul %131, %132, %cst_46 {dimension_numbers = #tpu.dot_dimension_numbers<[2], [1], [1], [2], [0, 0, 0, 1, 1, 2], [0], [0]>} : vector<4x8x8xbf16>, vector<4x8x8xbf16>, vector<4x8x8xf32> -> vector<4x8x8xf32>
    "tpu.trace_stop"() : () -> ()
    %134 = tpu.concatenate %79, %97, %115, %133 in 2 : vector<4x8x8xf32>, vector<4x8x8xf32>, vector<4x8x8xf32>, vector<4x8x8xf32> -> vector<4x8x32xf32>
    %135 = vector.shape_cast %134 : vector<4x8x32xf32> to vector<32x32xf32>
    %136 = arith.truncf %135 : vector<32x32xf32> to vector<32x32xbf16>
    %cst_47 = arith.constant dense<0.000000e+00> : vector<32x32xf32>
    %137 = tpu.matmul %136, %24, %cst_47 {dimension_numbers = #tpu.dot_dimension_numbers<[1], [0], [0], [1], [0, 0, 1, 1], [], []>} : vector<32x32xbf16>, vector<32x32xbf16>, vector<32x32xf32> -> vector<32x32xf32>
    %138 = arith.addf %30, %137 : vector<32x32xf32>
    %139 = vector.broadcast %25 : vector<1x32xf32> to vector<32x32xf32>
    %140 = arith.addf %138, %139 : vector<32x32xf32>
    %cst_48 = arith.constant dense<0.000000e+00> : vector<32xf32>
    %141 = vector.multi_reduction <add>, %140, %cst_48 [1] : vector<32x32xf32> to vector<32xf32>
    %142 = vector.shape_cast %141 : vector<32xf32> to vector<32x1xf32>
    %cst_49 = arith.constant 3.200000e+01 : f32
    %143 = vector.broadcast %cst_49 : f32 to vector<32x1xf32>
    %144 = arith.divf %142, %143 : vector<32x1xf32>
    %145 = vector.broadcast %144 : vector<32x1xf32> to vector<32x32xf32>
    %146 = arith.subf %140, %145 : vector<32x32xf32>
    %147 = arith.mulf %146, %146 : vector<32x32xf32>
    %cst_50 = arith.constant dense<0.000000e+00> : vector<32xf32>
    %148 = vector.multi_reduction <add>, %147, %cst_50 [1] : vector<32x32xf32> to vector<32xf32>
    %149 = vector.shape_cast %148 : vector<32xf32> to vector<32x1xf32>
    %cst_51 = arith.constant 3.200000e+01 : f32
    %150 = vector.broadcast %cst_51 : f32 to vector<32x1xf32>
    %151 = arith.divf %149, %150 : vector<32x1xf32>
    %152 = vector.broadcast %144 : vector<32x1xf32> to vector<32x32xf32>
    %153 = arith.subf %140, %152 : vector<32x32xf32>
    %cst_52 = arith.constant 9.99999974E-6 : f32
    %154 = vector.broadcast %cst_52 : f32 to vector<32x1xf32>
    %155 = arith.addf %151, %154 : vector<32x1xf32>
    %156 = math.rsqrt %155 : vector<32x1xf32>
    %157 = vector.broadcast %156 : vector<32x1xf32> to vector<32x32xf32>
    %158 = arith.mulf %153, %157 : vector<32x32xf32>
    %159 = arith.truncf %158 : vector<32x32xf32> to vector<32x32xbf16>
    %cst_53 = arith.constant dense<0.000000e+00> : vector<32x128xf32>
    %160 = tpu.matmul %159, %26, %cst_53 {dimension_numbers = #tpu.dot_dimension_numbers<[1], [0], [0], [1], [0, 0, 1, 1], [], []>} : vector<32x32xbf16>, vector<32x128xbf16>, vector<32x128xf32> -> vector<32x128xf32>
    %161 = vector.broadcast %27 : vector<1x128xf32> to vector<32x128xf32>
    %162 = arith.addf %160, %161 : vector<32x128xf32>
    %cst_54 = arith.constant 0.000000e+00 : f32
    %163 = vector.broadcast %cst_54 : f32 to vector<32x128xf32>
    %164 = arith.maximumf %162, %163 : vector<32x128xf32>
    %165 = arith.truncf %164 : vector<32x128xf32> to vector<32x128xbf16>
    %cst_55 = arith.constant dense<0.000000e+00> : vector<32x32xf32>
    %166 = tpu.matmul %165, %28, %cst_55 {dimension_numbers = #tpu.dot_dimension_numbers<[1], [0], [0], [1], [0, 0, 1, 1], [], []>} : vector<32x128xbf16>, vector<128x32xbf16>, vector<32x32xf32> -> vector<32x32xf32>
    %167 = arith.addf %140, %166 : vector<32x32xf32>
    %168 = vector.broadcast %29 : vector<1x32xf32> to vector<32x32xf32>
    %169 = arith.addf %167, %168 : vector<32x32xf32>
    %170 = vector.shape_cast %169 : vector<32x32xf32> to vector<4x8x32xf32>
    %c0_56 = arith.constant 0 : index
    %c0_57 = arith.constant 0 : index
    %c0_58 = arith.constant 0 : index
    %171 = vector.load %arg12[%c0_56, %c0_57, %c0_58] : memref<4x8x32xf32, #tpu.memory_space<vmem>>, vector<4x8x32xf32>
    tpu.vector_store %arg12[%c0_56, %c0_57, %c0_58], %170 {strides = array<i32>} : memref<4x8x32xf32, #tpu.memory_space<vmem>>, vector<4x8x32xf32>,
    return
  }
  func.func @transform_0(%arg0: i32) -> (i32, i32, i32) {
    %c0_i32 = arith.constant 0 : i32
    %c0_i32_0 = arith.constant 0 : i32
    %c0_i32_1 = arith.constant 0 : i32
    return %arg0, %c0_i32, %c0_i32_0 : i32, i32, i32
  }
  func.func @transform_1(%arg0: i32) -> (i32, i32) {
    %c0_i32 = arith.constant 0 : i32
    %c0_i32_0 = arith.constant 0 : i32
    %c0_i32_1 = arith.constant 0 : i32
    return %c0_i32, %c0_i32_0 : i32, i32
  }
  func.func @transform_2(%arg0: i32) -> (i32, i32) {
    %c0_i32 = arith.constant 0 : i32
    %c0_i32_0 = arith.constant 0 : i32
    %c0_i32_1 = arith.constant 0 : i32
    return %c0_i32, %c0_i32_0 : i32, i32
  }
  func.func @transform_3(%arg0: i32) -> (i32, i32) {
    %c0_i32 = arith.constant 0 : i32
    %c0_i32_0 = arith.constant 0 : i32
    %c0_i32_1 = arith.constant 0 : i32
    return %c0_i32, %c0_i32_0 : i32, i32
  }
  func.func @transform_4(%arg0: i32) -> (i32, i32) {
    %c0_i32 = arith.constant 0 : i32
    %c0_i32_0 = arith.constant 0 : i32
    %c0_i32_1 = arith.constant 0 : i32
    return %c0_i32, %c0_i32_0 : i32, i32
  }
  func.func @transform_5(%arg0: i32) -> (i32, i32) {
    %c0_i32 = arith.constant 0 : i32
    %c0_i32_0 = arith.constant 0 : i32
    %c0_i32_1 = arith.constant 0 : i32
    return %c0_i32, %c0_i32_0 : i32, i32
  }
  func.func @transform_6(%arg0: i32) -> (i32, i32) {
    %c0_i32 = arith.constant 0 : i32
    %c0_i32_0 = arith.constant 0 : i32
    %c0_i32_1 = arith.constant 0 : i32
    return %c0_i32, %c0_i32_0 : i32, i32
  }
  func.func @transform_7(%arg0: i32) -> (i32, i32) {
    %c0_i32 = arith.constant 0 : i32
    %c0_i32_0 = arith.constant 0 : i32
    %c0_i32_1 = arith.constant 0 : i32
    return %c0_i32, %c0_i32_0 : i32, i32
  }
  func.func @transform_8(%arg0: i32) -> (i32, i32) {
    %c0_i32 = arith.constant 0 : i32
    %c0_i32_0 = arith.constant 0 : i32
    %c0_i32_1 = arith.constant 0 : i32
    return %c0_i32, %c0_i32_0 : i32, i32
  }
  func.func @transform_9(%arg0: i32) -> (i32, i32) {
    %c0_i32 = arith.constant 0 : i32
    %c0_i32_0 = arith.constant 0 : i32
    %c0_i32_1 = arith.constant 0 : i32
    return %c0_i32, %c0_i32_0 : i32, i32
  }
  func.func @transform_10(%arg0: i32) -> (i32, i32) {
    %c0_i32 = arith.constant 0 : i32
    %c0_i32_0 = arith.constant 0 : i32
    %c0_i32_1 = arith.constant 0 : i32
    return %c0_i32, %c0_i32_0 : i32, i32
  }
  func.func @transform_11(%arg0: i32) -> (i32, i32, i32) {
    %c0_i32 = arith.constant 0 : i32
    %c0_i32_0 = arith.constant 0 : i32
    %c0_i32_1 = arith.constant 0 : i32
    return %arg0, %c0_i32, %c0_i32_0 : i32, i32, i32
  }
}

</mosaic_0001>

<bundles_post_ra>
// kernel: tpu_custom_call.1
= control target key start
LH: loop header
LB: loop body
LE: loop exit
PB: predicated region body
PF: predicated region fallthrough
CT: control target
= control target key end

     0   :  { %16 = vsyncpa [#allocation3], 0  ;;  %s4164_s0 = inlined_call_operand.vmem [shape: f32[8,8,2], index: 0, kind: input, shape index: {}]   ;;  %s4165_s1 = inlined_call_operand.vmem [shape: f32[2,32], index: 1, kind: input, shape index: {}]   ;;  %s4166_s2 = inlined_call_operand.vmem [shape: f32[1,32], index: 2, kind: input, shape index: {}]   ;;  %s4167_s3 = inlined_call_operand.vmem [shape: bf16[32,96], index: 3, kind: input, shape index: {}]   ;;  %s4168_s4 = inlined_call_operand.vmem [shape: f32[1,96], index: 4, kind: input, shape index: {}]   ;;  %s4169_s5 = inlined_call_operand.vmem [shape: bf16[32,32], index: 5, kind: input, shape index: {}]   ;;  %s4170_s6 = inlined_call_operand.vmem [shape: f32[1,32], index: 6, kind: input, shape index: {}]   ;;  %s4171_s7 = inlined_call_operand.vmem [shape: bf16[32,128], index: 7, kind: input, shape index: {}]   ;;  %s4172_s8 = inlined_call_operand.vmem [shape: f32[1,128], index: 8, kind: input, shape index: {}]   ;;  %s4173_s9 = inlined_call_operand.vmem [shape: bf16[128,32], index: 9, kind: input, shape index: {}]   ;;  %s4174_s10 = inlined_call_operand.vmem [shape: f32[1,32], index: 10, kind: input, shape index: {}]   ;;  %s4175_s11 = inlined_call_operand.hbm [shape: f32[8,8,32], index: 11, kind: output, shape index: {}]  }
   0x1   :  { %18 = vsyncpa [#allocation3 + $0x1], 0  ;;  %s3604_s17 = smov 0   ;;  %s3606_s18 = smov 0  }
   0x2   :  { %s3608_s19 = smov 0   ;;  %s3610_s20 = smov 0  }
   0x3 LB: > { %s3625_s21 = sadd.s32 4294967295, %s3522_s20   ;;  %s2873_s22 = sadd.s32 4294967294, %s3522_s20   ;;  %s3522_s20 = sphi %s3610_s20, %s4183_s20   ;;  %s3518_s19 = sphi %s3608_s19, %s4182_s19   ;;  %s3514_s18 = sphi %s3606_s18, %s4181_s18   ;;  %s3510_s17 = sphi %s3604_s17, %s4180_s17  }
   0x4   : > { %s3629_s23 = sadd.s32 1, %s3522_s20   ;;  %s267_s24 = sadd.s32 1, %s3518_s19 }
   0x5   : > { %s264_s25 = ssub.s32 %s3522_s20, %s3629_s23  ;;  %p277_p0 = scmp.ne.s32.totalorder %s3518_s19, %s3514_s18 }
   0x6   : > { %p265_p1 = scmp.eq.s32.totalorder %s264_s25, 0  ;;  %p278_p2 = scmp.eq.s32.totalorder %s3625_s21, 1 }
   0x7   : > { %p283_p3 = scmp.ne.s32.totalorder %s3514_s18, %s3510_s17  ;;  %p284_p4 = scmp.eq.s32.totalorder %s2873_s22, 1 }
   0x8   : > { %s3640_s26 = scalar_select %p265_p1, %s3518_s19, %s267_s24  }
   0x9   : > { %p3642_p5 = por %p278_p2, %p277_p0  ;;  %p3646_p6 = por %p284_p4, %p283_p3 }
   0xa   : > { %p2876_p7 = scmp.ge.s32.totalorder %s3522_s20, 1  ;;  %p341_p8 = scmp.lt.s32.totalorder %s3522_s20, 3 }
   0xc   : > { %p342_p9 = pnand %p2876_p7, %p341_p8 }
   0xd   : > { %s2878_s29 = sshll.u32 (!%p342_p9), %s3625_s21, 2  ;;  %v3524_v0 = vmov (!%p342_p9), 1   ;;  %v3525_v1 = vmov (!%p342_p9), 0   ;;  %v414_v6 = vlaneseq (!%p342_p9)  ;;  %v393_v10 = vld [vmem:[%s4165_s1] sm:$0x3] (!%p342_p9)  ;;  %vm493_vm0 = vcmask (!%p342_p9), 261120  }
   0xe   : > { %345 = sbr.rel (%p342_p9) target bundleno = 4468 (0x1174), region = 64  ;;  %3332 = vset.pattern.permute.xlu1 (!%p342_p9), %v3524_v0  ;;  %3331 = vset.pattern.permute.xlu0 (!%p342_p9), %v3525_v1  ;;  %p382_p10 = scmp.lt.s32.totalorder (!%p342_p9), %s2878_s29, 7  ;;  %v2880_v17 = vld [vmem:[%s4166_s2] ss:$0 sm:$0xff] (!%p342_p9)  ;;  %v3367_v63 = vld [vmem:[%s4167_s3 + $0x8] sm:$0xff] (!%p342_p9)   ;;  %vm3527_vm1 = vmmov (!%p342_p9), 0  }
   0xf   : > { %v415_v7 = vshrl.u32 (!%p342_p9), %v414_v6, 7  ;;  %v3366_v62 = vld [vmem:[%s4167_s3] sm:$0xff] (!%p342_p9)   ;;  %s3528_s15 = smov (!%p342_p9), 96   ;;  %vm636_vm2 = vcmask (!%p342_p9), 64512   ;;  %s3529_s16 = smov (!%p342_p9), 64   ;;  %vm884_vm3 = vcmask (!%p342_p9), 1043456  }
  0x10   : > { %3037 = vmatprep.subr.bf16.mxu0 (!%p342_p9), %v3366_v62  ;;  %s3530_s22 = smov (!%p342_p9), 88   ;;  %s3531_s24 = smov (!%p342_p9), 120   ;;  %vm2456_vm4 = vcmask (!%p342_p9), 130048   ;;  %vm2461_vm5 = vcmask (!%p342_p9), 195584  }
  0x11   : > { %v440_v8 = vsub.s32 (!%p342_p9), 1, %v415_v7  ;;  %v416_v9 = vsub.s32 (!%p342_p9), 0, %v415_v7  ;;  %3038 = vmatpush3.bf16.msra.mxu0 (!%p342_p9), %v3366_v62  ;;  %s3532_s25 = smov (!%p342_p9), 56   ;;  %s3535_s12 = smov (!%p342_p9), 48  }
  0x12   : > { %3039 = vmatprep.subr.bf16.mxu0 (!%p342_p9), %v3367_v63  ;;  %s3536_s13 = smov (!%p342_p9), 72  }
  0x13   : > { %v441_v11 = vrot.slane (!%p342_p9), %v393_v10, %v440_v8  ;;  %v417_v12 = vrot.slane (!%p342_p9), %v393_v10, %v416_v9 }
  0x15   : > { %s4185_s29 = smov (!%p382_p10, %s2878_s29), 7  ;;  %3040 = vmatpush3.bf16.msra.mxu0 %v3367_v63 }
  0x16   : > { %s2879_s30 = sshll.u32 %s4185_s29, 3  ;;  %s3533_s29 = smov 80  }
  0x17   : > { %s385_s14 = scalar_lea.vmem %s4164_s0, %s2879_s30  ;;  %s3534_s30 = smov 112  }
  0x18   : > { %v389_v2 = vld [vmem:[%s385_s14] sm:$0xff]  ;;  %v390_v3 = vld [vmem:[%s385_s14 + $0x8] sm:$0xff]  ;;  %v391_v4 = vld [vmem:[%s385_s14 + $0x10] sm:$0xff] }
  0x19   : > { %423 = vperm.xlu1 %3332, %v389_v2   ;;  %396 = vperm.xlu0 %3331, %v389_v2   ;;  %v392_v5 = vld [vmem:[%s385_s14 + $0x18] sm:$0xff]  ;;  %s3537_s14 = smov 104  }
  0x1d   : > { %427 = vperm.xlu1 %3332, %v390_v3   ;;  %401 = vperm.xlu0 %3331, %v390_v3  }
  0x21   : > { %3333 = vset.pattern.permute.xlu1 %v3525_v1  ;;  %406 = vperm.xlu0 %3331, %v391_v4  }
  0x22   : > { %411 = vperm.xlu1 %3333, %v392_v5  }
  0x25   : > { %3334 = vset.pattern.permute.xlu0 %v3524_v0 }
  0x26   : > { %3335 = vset.pattern.permute.xlu1 %v3524_v0  ;;  %431 = vperm.xlu0 %3334, %v391_v4  }
  0x27   : > { %435 = vperm.xlu1 %3335, %v392_v5  }
  0x98   : > { %v424_v13 = vpop.permute.xlu1 %423  ;;  %v397_v14 = vpop.permute.xlu0 %396 }
  0x99   : > { %v442_v15 = vmul.f32 %v441_v11, %v424_v13  ;;  %v418_v16 = vmul.f32 %v417_v12, %v397_v14 }
  0x9b   : > { %v446_v18 = vadd.f32 %v442_v15, %v418_v16 }
  0x9c   : > { %v428_v19 = vpop.permute.xlu1 %427  ;;  %v402_v20 = vpop.permute.xlu0 %401 }
  0x9d   : > { %v443_v21 = vmul.f32 %v441_v11, %v428_v19  ;;  %v419_v22 = vmul.f32 %v417_v12, %v402_v20  ;;  %v3662_v23 = vadd.f32 %v2880_v17, %v446_v18 }
  0x9f   : > { %v447_v24 = vadd.f32 %v443_v21, %v419_v22  ;;  %v494_v25 = vsel %vm493_vm0, %v3662_v23, 0.0  ;;  %v3526_v22 = vmov 0.0  }
  0xa0   : > { %495 = vadd.xlane.f32.xlu1 %v494_v25  ;;  %v407_v26 = vpop.permute.xlu0 %406  ;;  %3045 = vmatprep.subr.bf16.mxu0 %v3526_v22 }
  0xa1   : > { %v412_v27 = vpop.permute.xlu1 %411  ;;  %v3666_v28 = vadd.f32 %v2880_v17, %v447_v24  ;;  %v420_v31 = vmul.f32 %v417_v12, %v407_v26  ;;  %3057 = vmatprep.subr.bf16.mxu1 %v3526_v22  ;;  %v2881_v24 = vld [vmem:[%s4168_s4] ss:$0 sm:$0xff]  ;;  %3059 = vmatprep.mubr.msk.bf16.mxu1 %vm3527_vm1, %v3526_v22 }
  0xa2   : > { %v421_v34 = vmul.f32 %v417_v12, %v412_v27 }
  0xa3   : > { %v497_v29 = vsel %vm493_vm0, %v3666_v28, 0.0 }
  0xa4   : > { %498 = vadd.xlane.f32.xlu0 %v497_v29 }
  0xa5   : > { %v432_v30 = vpop.permute.xlu0 %431 }
  0xa6   : > { %v444_v32 = vmul.f32 %v441_v11, %v432_v30  ;;  %v436_v33 = vpop.permute.xlu1 %435 }
  0xa7   : > { %v445_v35 = vmul.f32 %v441_v11, %v436_v33 }
  0xa8   : > { %v448_v36 = vadd.f32 %v444_v32, %v420_v31 }
  0xa9   : > { %v449_v37 = vadd.f32 %v445_v35, %v421_v34 }
  0xaa   : > { %v3670_v38 = vadd.f32 %v2880_v17, %v448_v36 }
  0xab   : > { %v3672_v39 = vadd.f32 %v2880_v17, %v449_v37 }
  0xac   : > { %v500_v40 = vsel %vm493_vm0, %v3670_v38, 0.0 }
  0xad   : > { %501 = vadd.xlane.f32.xlu0 %v500_v40  ;;  %v503_v41 = vsel %vm493_vm0, %v3672_v39, 0.0 }
  0xae   : > { %504 = vadd.xlane.f32.xlu1 %v503_v41 }
 0x12d   : > { %v496_v42 = vpop.xlane.xlu1 %495 }
 0x12e   : > { %v507_v43 = vmul.f32 0.03125, %v496_v42 }
 0x130   : > { %v511_v44 = vsub.f32 %v3662_v23, %v507_v43 }
 0x131   : > { %v499_v45 = vpop.xlane.xlu0 %498 }
 0x132   : > { %v508_v46 = vmul.f32 0.03125, %v499_v45  ;;  %v515_v47 = vmul.f32 %v511_v44, %v511_v44 }
 0x134   : > { %v512_v48 = vsub.f32 %v3666_v28, %v508_v46  ;;  %v519_v49 = vsel %vm493_vm0, %v515_v47, 0.0 }
 0x135   : > { %520 = vadd.xlane.f32.xlu0 %v519_v49 }
 0x136   : > { %v516_v50 = vmul.f32 %v512_v48, %v512_v48 }
 0x138   : > { %v522_v51 = vsel %vm493_vm0, %v516_v50, 0.0 }
 0x139   : > { %523 = vadd.xlane.f32.xlu1 %v522_v51 }
 0x13a   : > { %v502_v52 = vpop.xlane.xlu0 %501 }
 0x13b   : > { %v509_v53 = vmul.f32 0.03125, %v502_v52  ;;  %v505_v54 = vpop.xlane.xlu1 %504 }
 0x13c   : > { %v510_v55 = vmul.f32 0.03125, %v505_v54 }
 0x13d   : > { %v513_v56 = vsub.f32 %v3670_v38, %v509_v53 }
 0x13e   : > { %v514_v57 = vsub.f32 %v3672_v39, %v510_v55 }
 0x13f   : > { %v517_v58 = vmul.f32 %v513_v56, %v513_v56 }
 0x140   : > { %v518_v59 = vmul.f32 %v514_v57, %v514_v57 }
 0x141   : > { %v525_v60 = vsel %vm493_vm0, %v517_v58, 0.0 }
 0x142   : > { %526 = vadd.xlane.f32.xlu0 %v525_v60  ;;  %v528_v61 = vsel %vm493_vm0, %v518_v59, 0.0 }
 0x143   : > { %529 = vadd.xlane.f32.xlu1 %v528_v61 }
 0x1c2   : > { %v521_v0 = vpop.xlane.xlu0 %520 }
 0x1c3   : > { %v531_v1 = vmul.f32 0.03125, %v521_v0 }
 0x1c5   : > { %v535_v2 = vadd.f32 1e-05, %v531_v1 }
 0x1c6   : > { %v524_v3 = vpop.xlane.xlu1 %523 }
 0x1c7   : > { %v532_v4 = vmul.f32 0.03125, %v524_v3  ;;  %3380 = vrsqrt.f32 %v535_v2 }
 0x1c9   : > { %v536_v5 = vadd.f32 1e-05, %v532_v4 }
 0x1cb   : > { %3382 = vrsqrt.f32 %v536_v5 }
 0x1cf   : > { %v527_v6 = vpop.xlane.xlu0 %526 }
 0x1d0   : > { %v533_v7 = vmul.f32 0.03125, %v527_v6  ;;  %v530_v8 = vpop.xlane.xlu1 %529 }
 0x1d1   : > { %v534_v9 = vmul.f32 0.03125, %v530_v8  ;;  %v3381_v11 = vpop.eup %3380 }
 0x1d2   : > { %v537_v10 = vadd.f32 1e-05, %v533_v7  ;;  %v543_v14 = vmul.f32 %v3381_v11, %v511_v44 }
 0x1d3   : > { %v538_v12 = vadd.f32 1e-05, %v534_v9 }
 0x1d4   : > { %3384 = vrsqrt.f32 %v537_v10 }
 0x1d5   : > { %v3383_v13 = vpop.eup %3382  ;;  %3386 = vrsqrt.f32 %v538_v12 }
 0x1d6   : > { %v544_v15 = vmul.f32 %v3383_v13, %v512_v48 }
 0x1d8   : > { %v547_v16 = vpack.c.bf16 %v544_v15, %v543_v14 }
 0x1da   : > { %3041 = vmatprep.mubr.msk.bf16.mxu0 %vm493_vm0, %v547_v16 }
 0x1de   : > { %v3385_v17 = vpop.eup %3384 }
 0x1df   : > { %v3387_v18 = vpop.eup %3386  ;;  %v545_v19 = vmul.f32 %v3385_v17, %v513_v56 }
 0x1e0   : > { %v546_v20 = vmul.f32 %v3387_v18, %v514_v57 }
 0x1e2   : > { %v548_v21 = vpack.c.bf16 %v546_v20, %v545_v19 }
 0x1e4   : > { %3042 = vmatmul.mubr.msk.bf16.vlgmr.msra.gmra.mrb[0].mxu0 %vm493_vm0, %v548_v21 }
 0x1e5   : > { %3047 = vmatprep.mubr.msk.bf16.mxu0 %vm3527_vm1, %v3526_v22 }
 0x2b7   : > { %v3043_v25 = vpop.f32.mrb[0].mxu0 }
 0x2b8   : > { %v607_v26 = vpop.f32.mrb[1].mxu0  ;;  %v616_v34 = vadd.f32 %v3043_v25, %v2881_v24 }
 0x2b9   : > { %v608_v27 = vadd.f32 %v2881_v24, %v607_v26  ;;  %v3044_v29 = vpop.f32.mrb[2].mxu0 }
 0x2ba   : > { %v610_v30 = vpop.f32.mrb[3].mxu0  ;;  %v619_v32 = vadd.f32 %v3044_v29, %v2881_v24  ;;  %v3711_v37 = vpack.c.bf16 %v616_v34, %v616_v34 }
 0x2bb   : > { %v3703_v31 = vpack.c.bf16 %v608_v27, %v608_v27  ;;  %v611_v33 = vadd.f32 %v2881_v24, %v610_v30 }
 0x2bc   : > { %v3708_v36 = vpack.c.bf16 %v619_v32, %v619_v32 }
 0x2bd   : > { %v3705_v35 = vpack.c.bf16 %v611_v33, %v611_v33  ;;  %634 = vrot.lane.b32.xlu0 %v3703_v31, %s3528_s15 }
 0x2bf   : > { %683 = vrot.lane.b32.xlu1 %v3705_v35, %s3528_s15 }
 0x2c1   : > { %779 = vrot.lane.b32.xlu0 %v3708_v36, %s3528_s15 }
 0x2c3   : > { %731 = vrot.lane.b32.xlu1 %v3711_v37, %s3528_s15  ;;  %s3538_s15 = smov 40  }
 0x32f   : > { %v635_v40 = vpop.permute.xlu0 %634 }
 0x330   : > { %v641_v41 = vsel %vm636_vm2, %v635_v40, 0 }
 0x331   : > { %v684_v42 = vpop.permute.xlu1 %683  ;;  %3046 = vmatpush3.bf16.xpose.msra.mxu0 %v641_v41 }
 0x332   : > { %3051 = vmatprep.subr.bf16.mxu0 %v3526_v22  ;;  %v689_v45 = vsel %vm636_vm2, %v684_v42, 0 }
 0x333   : > { %v780_v46 = vpop.permute.xlu0 %779 }
 0x334   : > { %v785_v47 = vsel %vm636_vm2, %v780_v46, 0 }
 0x335   : > { %v732_v43 = vpop.permute.xlu1 %731 }
 0x336   : > { %v737_v44 = vsel %vm636_vm2, %v732_v43, 0 }
 0x337   : > { %3058 = vmatpush3.bf16.xpose.msra.mxu1 %v737_v44 }
 0x338   : > { %3048 = vmatmul.mubr.msk.bf16.vlgmr.msra.gmra.mrb[4].mxu0 %vm636_vm2, %v3703_v31  ;;  %3069 = vmatprep.subr.bf16.mxu1 %v3526_v22 }
 0x339   : > { %3052 = vmatpush3.bf16.xpose.msra.mxu0 %v689_v45  ;;  %3053 = vmatprep.mubr.msk.bf16.mxu0 %vm3527_vm1, %v3526_v22 }
 0x33a   : > { %3063 = vmatprep.subr.bf16.mxu0 %v3526_v22 }
 0x33e   : > { %3060 = vmatmul.mubr.msk.bf16.vlgmr.msra.gmra.mrb[0].mxu1 %vm636_vm2, %v3711_v37 }
 0x33f   : > { %3071 = vmatprep.mubr.msk.bf16.mxu1 %vm3527_vm1, %v3526_v22 }
 0x340   : > { %3054 = vmatmul.mubr.msk.bf16.vlgmr.msra.gmra.mrb[8].mxu0 %vm636_vm2, %v3705_v35 }
 0x341   : > { %3064 = vmatpush3.bf16.xpose.msra.mxu0 %v785_v47  ;;  %3065 = vmatprep.mubr.msk.bf16.mxu0 %vm3527_vm1, %v3526_v22 }
 0x342   : > { %3075 = vmatprep.subr.bf16.mxu0 %v3526_v22 }
 0x348   : > { %3066 = vmatmul.mubr.msk.bf16.vlgmr.msra.gmra.mrb[12].mxu0 %vm636_vm2, %v3708_v36 }
 0x349   : > { %3077 = vmatprep.mubr.msk.bf16.mxu0 %vm3527_vm1, %v3526_v22 }
 0x40b   : > { %v677_v48 = vpop.f32.mrb[4].mxu0 }
 0x40c   : > { %v827_v49 = vmul.f32 0.35355338, %v677_v48  ;;  %v3049_v50 = vpop.f32.mrb[5].mxu0 }
 0x40d   : > { %v680_v51 = vpop.f32.mrb[6].mxu0 }
 0x40e   : > { %v3050_v52 = vpop.f32.mrb[7].mxu0  ;;  %v831_v53 = vsel %vm636_vm2, %v827_v49, -inf }
 0x40f   : > { %832 = vmax.xlane.f32.xlu1 %v831_v53 }
 0x411   : > { %v773_v54 = vpop.f32.mrb[0].mxu1 }
 0x412   : > { %v3061_v55 = vpop.f32.mrb[1].mxu1  ;;  %v829_v62 = vmul.f32 0.35355338, %v773_v54 }
 0x413   : > { %v725_v56 = vpop.f32.mrb[8].mxu0  ;;  %v776_v57 = vpop.f32.mrb[2].mxu1 }
 0x414   : > { %v828_v58 = vmul.f32 0.35355338, %v725_v56  ;;  %v3055_v59 = vpop.f32.mrb[9].mxu0  ;;  %v3062_v60 = vpop.f32.mrb[3].mxu1  ;;  %v837_v1 = vsel %vm636_vm2, %v829_v62, -inf }
 0x415   : > { %v728_v61 = vpop.f32.mrb[10].mxu0 }
 0x416   : > { %v3056_v63 = vpop.f32.mrb[11].mxu0  ;;  %v834_v0 = vsel %vm636_vm2, %v828_v58, -inf }
 0x417   : > { %835 = vmax.xlane.f32.xlu0 %v834_v0 }
 0x41b   : > { %838 = vmax.xlane.f32.xlu0 %v837_v1  ;;  %v821_v2 = vpop.f32.mrb[12].mxu0 }
 0x41c   : > { %v3067_v3 = vpop.f32.mrb[13].mxu0  ;;  %v830_v6 = vmul.f32 0.35355338, %v821_v2 }
 0x41d   : > { %v824_v4 = vpop.f32.mrb[14].mxu0 }
 0x41e   : > { %v3068_v5 = vpop.f32.mrb[15].mxu0  ;;  %v840_v7 = vsel %vm636_vm2, %v830_v6, -inf }
 0x420   : > { %928 = vrot.lane.b32.xlu1 %v3705_v35, %s3529_s16 }
 0x431   : > { %879 = vrot.lane.b32.xlu0 %v3703_v31, %s3529_s16 }
 0x444   : > { %841 = vmax.xlane.f32.xlu1 %v840_v7 }
 0x455   : > { %976 = vrot.lane.b32.xlu1 %v3711_v37, %s3529_s16 }
 0x49c   : > { %v833_v8 = vpop.xlane.xlu1 %832 }
 0x49d   : > { %v843_v13 = vsub.f32 %v827_v49, %v833_v8 }
 0x49f   : > { %v847_v17 = vmul.f32 1.442695, %v843_v13 }
 0x4a0   : > { %v929_v9 = vpop.permute.xlu1 %928 }
 0x4a1   : > { %v934_v10 = vsel %vm884_vm3, %v929_v9, 0 }
 0x4a2   : > { %3076 = vmatpush3.bf16.msra.mxu0 %v934_v10 }
 0x4a3   : > { %3087 = vmatprep.subr.bf16.mxu0 %v3526_v22 }
 0x4a4   : > { %v836_v11 = vpop.xlane.xlu0 %835 }
 0x4a5   : > { %v844_v12 = vsub.f32 %v828_v58, %v836_v11 }
 0x4a7   : > { %v849_v14 = vmul.f32 1.442695, %v844_v12 }
 0x4a8   : > { %v839_v15 = vpop.xlane.xlu0 %838 }
 0x4a9   : > { %3388 = vpow2.f32 %v849_v14  ;;  %v845_v16 = vsub.f32 %v829_v62, %v839_v15 }
 0x4ab   : > { %v851_v18 = vmul.f32 1.442695, %v845_v16 }
 0x4ac   : > { %v880_v19 = vpop.permute.xlu0 %879 }
 0x4ad   : > { %3390 = vpow2.f32 %v851_v18  ;;  %v886_v20 = vsel %vm884_vm3, %v880_v19, 0 }
 0x4ae   : > { %3070 = vmatpush3.bf16.msra.mxu1 %v886_v20  ;;  %3392 = vpow2.f32 %v847_v17 }
 0x4af   : > { %3081 = vmatprep.subr.bf16.mxu1 %v3526_v22 }
 0x4b3   : > { %v3389_v21 = vpop.eup %3388 }
 0x4b4   : > { %v858_v24 = vsel %vm636_vm2, %v3389_v21, 0.0 }
 0x4b5   : > { %859 = vadd.xlane.f32.xlu1 %v858_v24 }
 0x4b7   : > { %v3391_v25 = vpop.eup %3390 }
 0x4b8   : > { %v861_v26 = vsel %vm636_vm2, %v3391_v25, 0.0  ;;  %v3393_v27 = vpop.eup %3392 }
 0x4b9   : > { %862 = vadd.xlane.f32.xlu0 %v861_v26  ;;  %v855_v29 = vsel %vm636_vm2, %v3393_v27, 0.0 }
 0x4bd   : > { %856 = vadd.xlane.f32.xlu0 %v855_v29 }
 0x4c6   : > { %1074 = vrot.lane.b32.xlu1 %v3703_v31, %s3530_s22 }
 0x4d1   : > { %v842_v30 = vpop.xlane.xlu1 %841 }
 0x4d2   : > { %v846_v32 = vsub.f32 %v830_v6, %v842_v30 }
 0x4d3   : > { %1024 = vrot.lane.b32.xlu0 %v3708_v36, %s3529_s16  ;;  %s4176_s16 = smov 8  }
 0x4d4   : > { %v853_v33 = vmul.f32 1.442695, %v846_v32 }
 0x4d5   : > { %v977_v41 = vpop.permute.xlu1 %976 }
 0x4d6   : > { %3394 = vpow2.f32 %v853_v33  ;;  %v982_v54 = vsel %vm884_vm3, %v977_v41, 0 }
 0x4d7   : > { %1124 = vrot.lane.b32.xlu0 %v3705_v35, %s3530_s22 }
 0x4db   : > { %1122 = vrot.lane.b32.xlu0 %v3705_v35, %s3531_s24 }
 0x4df   : > { %1224 = vrot.lane.b32.xlu0 %v3708_v36, %s3530_s22 }
 0x4e0   : > { %v3395_v34 = vpop.eup %3394 }
 0x4e1   : > { %v864_v40 = vsel %vm636_vm2, %v3395_v34, 0.0 }
 0x4e3   : > { %1222 = vrot.lane.b32.xlu0 %v3708_v36, %s3531_s24 }
 0x4ea   : > { %865 = vadd.xlane.f32.xlu1 %v864_v40 }
 0x4fb   : > { %1072 = vrot.lane.b32.xlu1 %v3703_v31, %s3531_s24 }
 0x4ff   : > { %1174 = vrot.lane.b32.xlu1 %v3711_v37, %s3530_s22  ;;  %s3540_s22 = smov 16  }
 0x503   : > { %1172 = vrot.lane.b32.xlu1 %v3711_v37, %s3531_s24 }
 0x542   : > { %v860_v42 = vpop.xlane.xlu1 %859 }
 0x543   : > { %3396 = vrcp.f32 %v860_v42 }
 0x546   : > { %v863_v43 = vpop.xlane.xlu0 %862  ;;  %v1075_v56 = vpop.permute.xlu1 %1074 }
 0x547   : > { %v1080_v58 = vsel %vm636_vm2, %v1075_v56, 0 }
 0x54a   : > { %v857_v44 = vpop.xlane.xlu0 %856 }
 0x54b   : > { %3398 = vrcp.f32 %v857_v44 }
 0x54c   : > { %3400 = vrcp.f32 %v863_v43 }
 0x54d   : > { %v3397_v45 = vpop.eup %3396 }
 0x54e   : > { %v872_v46 = vmul.f32 %v3397_v45, %v3389_v21  ;;  %v1025_v47 = vpop.permute.xlu0 %1024 }
 0x54f   : > { %v1030_v49 = vsel %vm884_vm3, %v1025_v47, 0 }
 0x550   : > { %v876_v48 = vpack.c.bf16 %v872_v46, %v872_v46 }
 0x552   : > { %3078 = vmatmul.mubr.msk.bf16.vlgmr.msra.gmra.mrb[16].mxu0 %vm636_vm2, %v876_v48  ;;  %v1125_v62 = vpop.permute.xlu0 %1124 }
 0x553   : > { %3088 = vmatpush3.bf16.msra.mxu0 %v1030_v49  ;;  %3089 = vmatprep.mubr.msk.bf16.mxu0 %vm3527_vm1, %v3526_v22  ;;  %v1130_v4 = vsel %vm636_vm2, %v1125_v62, 0 }
 0x554   : > { %3099 = vmatprep.subr.bf16.mxu0 %v3526_v22 }
 0x555   : > { %v3399_v50 = vpop.eup %3398 }
 0x556   : > { %v871_v51 = vmul.f32 %v3399_v50, %v3393_v27  ;;  %v3401_v53 = vpop.eup %3400  ;;  %v1123_v3 = vpop.permute.xlu0 %1122 }
 0x557   : > { %v873_v55 = vmul.f32 %v3401_v53, %v3391_v25 }
 0x558   : > { %v875_v52 = vpack.c.bf16 %v871_v51, %v871_v51 }
 0x559   : > { %v877_v57 = vpack.c.bf16 %v873_v55, %v873_v55 }
 0x55a   : > { %3072 = vmatmul.mubr.msk.bf16.vlgmr.msra.gmra.mrb[4].mxu1 %vm636_vm2, %v875_v52  ;;  %v1225_v6 = vpop.permute.xlu0 %1224 }
 0x55b   : > { %3082 = vmatpush3.bf16.msra.mxu1 %v982_v54  ;;  %3083 = vmatprep.mubr.msk.bf16.mxu1 %vm3527_vm1, %v3526_v22  ;;  %v1230_v7 = vsel %vm636_vm2, %v1225_v6, 0 }
 0x55c   : > { %3093 = vmatprep.subr.bf16.mxu1 %v3526_v22 }
 0x55e   : > { %v1223_v8 = vpop.permute.xlu0 %1222 }
 0x562   : > { %3084 = vmatmul.mubr.msk.bf16.vlgmr.msra.gmra.mrb[8].mxu1 %vm636_vm2, %v877_v57 }
 0x563   : > { %3095 = vmatprep.mubr.msk.bf16.mxu1 %vm3527_vm1, %v3526_v22 }
 0x564   : > { %3094 = vmatpush3.bf16.xpose.msra.mxu1 %v1080_v58 }
 0x565   : > { %3105 = vmatprep.subr.bf16.mxu1 %v3526_v22 }
 0x577   : > { %v866_v59 = vpop.xlane.xlu1 %865 }
 0x578   : > { %3402 = vrcp.f32 %v866_v59 }
 0x57b   : > { %v1073_v60 = vpop.permute.xlu1 %1072 }
 0x57c   : > { %3096 = vmatmul.mubr.msk.bf16.vlgmr.msra.gmra.mrb[12].mxu1 %vm636_vm2, %v1073_v60 }
 0x57d   : > { %3107 = vmatprep.mubr.msk.bf16.mxu1 %vm3527_vm1, %v3526_v22 }
 0x57f   : > { %v1175_v61 = vpop.permute.xlu1 %1174 }
 0x580   : > { %v1180_v63 = vsel %vm636_vm2, %v1175_v61, 0 }
 0x581   : > { %3106 = vmatpush3.bf16.xpose.msra.mxu1 %v1180_v63 }
 0x582   : > { %v3403_v0 = vpop.eup %3402  ;;  %3117 = vmatprep.subr.bf16.mxu1 %v3526_v22 }
 0x583   : > { %v874_v1 = vmul.f32 %v3403_v0, %v3395_v34  ;;  %v1173_v5 = vpop.permute.xlu1 %1172 }
 0x585   : > { %v878_v2 = vpack.c.bf16 %v874_v1, %v874_v1 }
 0x587   : > { %3090 = vmatmul.mubr.msk.bf16.vlgmr.msra.gmra.mrb[20].mxu0 %vm636_vm2, %v878_v2 }
 0x588   : > { %3100 = vmatpush3.bf16.xpose.msra.mxu0 %v1130_v4  ;;  %3108 = vmatmul.mubr.msk.bf16.vlgmr.msra.gmra.mrb[16].mxu1 %vm636_vm2, %v1173_v5 }
 0x589   : > { %3101 = vmatprep.mubr.msk.bf16.mxu0 %vm3527_vm1, %v3526_v22  ;;  %3111 = vmatprep.subr.bf16.mxu0 %v3526_v22 }
 0x58a   : > { %3119 = vmatprep.mubr.msk.bf16.mxu1 %vm3527_vm1, %v3526_v22 }
 0x58f   : > { %3102 = vmatmul.mubr.msk.bf16.vlgmr.msra.gmra.mrb[24].mxu0 %vm636_vm2, %v1123_v3 }
 0x590   : > { %3112 = vmatpush3.bf16.xpose.msra.mxu0 %v1230_v7  ;;  %3113 = vmatprep.mubr.msk.bf16.mxu0 %vm3527_vm1, %v3526_v22 }
 0x591   : > { %3123 = vmatprep.subr.bf16.mxu0 %v3526_v22 }
 0x597   : > { %3114 = vmatmul.mubr.msk.bf16.vlgmr.msra.gmra.mrb[28].mxu0 %vm636_vm2, %v1223_v8 }
 0x598   : > { %3125 = vmatprep.mubr.msk.bf16.mxu0 %vm3527_vm1, %v3526_v22 }
 0x625   : > { %v3803_v9 = vpop.f32.mrb[16].mxu0 }
 0x626   : > { %v3079_v10 = vpop.f32.mrb[17].mxu0 }
 0x627   : > { %v973_v11 = vpop.f32.mrb[18].mxu0 }
 0x628   : > { %v3080_v12 = vpop.f32.mrb[19].mxu0 }
 0x62d   : > { %v3805_v13 = vpop.f32.mrb[4].mxu1 }
 0x62e   : > { %v3073_v14 = vpop.f32.mrb[5].mxu1 }
 0x62f   : > { %v925_v15 = vpop.f32.mrb[6].mxu1 }
 0x630   : > { %v3074_v16 = vpop.f32.mrb[7].mxu1 }
 0x635   : > { %v3807_v17 = vpop.f32.mrb[8].mxu1 }
 0x636   : > { %v3085_v18 = vpop.f32.mrb[9].mxu1 }
 0x637   : > { %v1021_v19 = vpop.f32.mrb[10].mxu1 }
 0x638   : > { %v3086_v20 = vpop.f32.mrb[11].mxu1 }
 0x64f   : > { %v1116_v21 = vpop.f32.mrb[12].mxu1 }
 0x650   : > { %v1272_v24 = vmul.f32 0.35355338, %v1116_v21  ;;  %v3097_v25 = vpop.f32.mrb[13].mxu1 }
 0x651   : > { %v1119_v26 = vpop.f32.mrb[14].mxu1 }
 0x652   : > { %v3098_v27 = vpop.f32.mrb[15].mxu1  ;;  %v1276_v29 = vsel %vm636_vm2, %v1272_v24, -inf }
 0x653   : > { %1277 = vmax.xlane.f32.xlu1 %v1276_v29 }
 0x65a   : > { %v3810_v30 = vpop.f32.mrb[20].mxu0 }
 0x65b   : > { %v3091_v32 = vpop.f32.mrb[21].mxu0  ;;  %v1216_v33 = vpop.f32.mrb[16].mxu1 }
 0x65c   : > { %v1069_v34 = vpop.f32.mrb[22].mxu0  ;;  %v3109_v40 = vpop.f32.mrb[17].mxu1  ;;  %v1274_v48 = vmul.f32 0.35355338, %v1216_v33 }
 0x65d   : > { %v3092_v41 = vpop.f32.mrb[23].mxu0  ;;  %v1219_v42 = vpop.f32.mrb[18].mxu1 }
 0x65e   : > { %v3110_v43 = vpop.f32.mrb[19].mxu1  ;;  %v1282_v51 = vsel %vm636_vm2, %v1274_v48, -inf }
 0x662   : > { %v1166_v44 = vpop.f32.mrb[24].mxu0 }
 0x663   : > { %v1273_v45 = vmul.f32 0.35355338, %v1166_v44  ;;  %v3103_v46 = vpop.f32.mrb[25].mxu0 }
 0x664   : > { %1372 = vrot.lane.b32.xlu1 %v3705_v35, %s3532_s25  ;;  %v1169_v47 = vpop.f32.mrb[26].mxu0 }
 0x665   : > { %v3104_v49 = vpop.f32.mrb[27].mxu0  ;;  %v1279_v50 = vsel %vm636_vm2, %v1273_v45, -inf }
 0x666   : > { %1280 = vmax.xlane.f32.xlu0 %v1279_v50 }
 0x66a   : > { %1283 = vmax.xlane.f32.xlu0 %v1282_v51  ;;  %v1266_v52 = vpop.f32.mrb[28].mxu0 }
 0x66b   : > { %v3115_v53 = vpop.f32.mrb[29].mxu0  ;;  %v1275_v56 = vmul.f32 0.35355338, %v1266_v52 }
 0x66c   : > { %v1269_v54 = vpop.f32.mrb[30].mxu0 }
 0x66d   : > { %v3116_v55 = vpop.f32.mrb[31].mxu0  ;;  %v1285_v57 = vsel %vm636_vm2, %v1275_v56, -inf }
 0x680   : > { %1324 = vrot.lane.b32.xlu0 %v3703_v31, %s3532_s25 }
 0x688   : > { %1286 = vmax.xlane.f32.xlu1 %v1285_v57 }
 0x699   : > { %1420 = vrot.lane.b32.xlu1 %v3711_v37, %s3532_s25 }
 0x6e0   : > { %v1278_v58 = vpop.xlane.xlu1 %1277 }
 0x6e1   : > { %v1288_v59 = vsub.f32 %v1272_v24, %v1278_v58 }
 0x6e3   : > { %v1292_v60 = vmul.f32 1.442695, %v1288_v59 }
 0x6e4   : > { %v1373_v61 = vpop.permute.xlu1 %1372 }
 0x6e5   : > { %3404 = vpow2.f32 %v1292_v60  ;;  %v1378_v62 = vsel %vm884_vm3, %v1373_v61, 0 }
 0x6e6   : > { %3124 = vmatpush3.bf16.msra.mxu0 %v1378_v62 }
 0x6e7   : > { %3135 = vmatprep.subr.bf16.mxu0 %v3526_v22 }
 0x6ef   : > { %v3405_v63 = vpop.eup %3404 }
 0x6f0   : > { %v1300_v0 = vsel %vm636_vm2, %v3405_v63, 0.0 }
 0x6f1   : > { %1301 = vadd.xlane.f32.xlu0 %v1300_v0 }
 0x6f3   : > { %v1281_v1 = vpop.xlane.xlu0 %1280 }
 0x6f4   : > { %v1289_v2 = vsub.f32 %v1273_v45, %v1281_v1 }
 0x6f6   : > { %v1294_v3 = vmul.f32 1.442695, %v1289_v2 }
 0x6f7   : > { %v1284_v4 = vpop.xlane.xlu0 %1283 }
 0x6f8   : > { %3406 = vpow2.f32 %v1294_v3  ;;  %v1290_v10 = vsub.f32 %v1274_v48, %v1284_v4 }
 0x6fa   : > { %v1296_v11 = vmul.f32 1.442695, %v1290_v10 }
 0x6fb   : > { %v1325_v5 = vpop.permute.xlu0 %1324 }
 0x6fc   : > { %v1330_v6 = vsel %vm884_vm3, %v1325_v5, 0  ;;  %3408 = vpow2.f32 %v1296_v11 }
 0x6fd   : > { %3118 = vmatpush3.bf16.msra.mxu1 %v1330_v6 }
 0x6fe   : > { %3129 = vmatprep.subr.bf16.mxu1 %v3526_v22 }
 0x702   : > { %v3407_v7 = vpop.eup %3406 }
 0x703   : > { %v1303_v8 = vsel %vm636_vm2, %v3407_v7, 0.0 }
 0x704   : > { %1304 = vadd.xlane.f32.xlu1 %v1303_v8 }
 0x706   : > { %v3409_v14 = vpop.eup %3408 }
 0x707   : > { %1468 = vrot.lane.b32.xlu0 %v3708_v36, %s3532_s25  ;;  %v1306_v16 = vsel %vm636_vm2, %v3409_v14, 0.0 }
 0x715   : > { %1518 = vrot.lane.b32.xlu1 %v3703_v31, %s3533_s29  ;;  %v1287_v12 = vpop.xlane.xlu1 %1286 }
 0x716   : > { %v1291_v15 = vsub.f32 %v1275_v56, %v1287_v12 }
 0x718   : > { %v1298_v18 = vmul.f32 1.442695, %v1291_v15 }
 0x719   : > { %v1421_v26 = vpop.permute.xlu1 %1420 }
 0x71a   : > { %3410 = vpow2.f32 %v1298_v18  ;;  %v1426_v29 = vsel %vm884_vm3, %v1421_v26, 0 }
 0x724   : > { %v3411_v19 = vpop.eup %3410 }
 0x725   : > { %v1309_v20 = vsel %vm636_vm2, %v3411_v19, 0.0 }
 0x726   : > { %1307 = vadd.xlane.f32.xlu0 %v1306_v16 }
 0x739   : > { %1310 = vadd.xlane.f32.xlu1 %v1309_v20 }
 0x73c   : > { %1568 = vrot.lane.b32.xlu0 %v3705_v35, %s3533_s29 }
 0x740   : > { %1566 = vrot.lane.b32.xlu0 %v3705_v35, %s3534_s30 }
 0x744   : > { %1668 = vrot.lane.b32.xlu0 %v3708_v36, %s3533_s29 }
 0x748   : > { %1666 = vrot.lane.b32.xlu0 %v3708_v36, %s3534_s30 }
 0x74a   : > { %1516 = vrot.lane.b32.xlu1 %v3703_v31, %s3534_s30 }
 0x74e   : > { %1618 = vrot.lane.b32.xlu1 %v3711_v37, %s3533_s29  ;;  %s378_s29 = sand.u32 1, %s3514_s18  }
 0x752   : > { %1616 = vrot.lane.b32.xlu1 %v3711_v37, %s3534_s30  ;;  %s2877_s30 = sshll.u32 %s378_s29, 5 }
 0x77e   : > { %v1302_v21 = vpop.xlane.xlu0 %1301 }
 0x77f   : > { %3412 = vrcp.f32 %v1302_v21 }
 0x782   : > { %v1469_v40 = vpop.permute.xlu0 %1468 }
 0x783   : > { %v1474_v42 = vsel %vm884_vm3, %v1469_v40, 0 }
 0x789   : > { %v3413_v24 = vpop.eup %3412 }
 0x78a   : > { %v1316_v25 = vmul.f32 %v3413_v24, %v3405_v63 }
 0x78c   : > { %v1320_v27 = vpack.c.bf16 %v1316_v25, %v1316_v25 }
 0x78e   : > { %3120 = vmatmul.mubr.msk.bf16.vlgmr.msra.gmra.mrb[20].mxu1 %vm636_vm2, %v1320_v27 }
 0x78f   : > { %3130 = vmatpush3.bf16.msra.mxu1 %v1426_v29  ;;  %3131 = vmatprep.mubr.msk.bf16.mxu1 %vm3527_vm1, %v3526_v22 }
 0x790   : > { %3141 = vmatprep.subr.bf16.mxu1 %v3526_v22 }
 0x791   : > { %v1305_v32 = vpop.xlane.xlu1 %1304 }
 0x792   : > { %3414 = vrcp.f32 %v1305_v32 }
 0x795   : > { %v1519_v46 = vpop.permute.xlu1 %1518 }
 0x796   : > { %v1524_v48 = vsel %vm636_vm2, %v1519_v46, 0 }
 0x79c   : > { %v3415_v33 = vpop.eup %3414 }
 0x79d   : > { %v1317_v34 = vmul.f32 %v3415_v33, %v3407_v7 }
 0x79f   : > { %v1321_v41 = vpack.c.bf16 %v1317_v34, %v1317_v34 }
 0x7a1   : > { %3126 = vmatmul.mubr.msk.bf16.vlgmr.msra.gmra.mrb[32].mxu0 %vm636_vm2, %v1321_v41 }
 0x7a2   : > { %3136 = vmatpush3.bf16.msra.mxu0 %v1474_v42  ;;  %3137 = vmatprep.mubr.msk.bf16.mxu0 %vm3527_vm1, %v3526_v22 }
 0x7a3   : > { %3147 = vmatprep.subr.bf16.mxu0 %v3526_v22 }
 0x7b3   : > { %v1308_v43 = vpop.xlane.xlu0 %1307 }
 0x7b4   : > { %3416 = vrcp.f32 %v1308_v43 }
 0x7b7   : > { %v1569_v52 = vpop.permute.xlu0 %1568 }
 0x7b8   : > { %v1574_v58 = vsel %vm636_vm2, %v1569_v52, 0 }
 0x7bb   : > { %v1567_v57 = vpop.permute.xlu0 %1566 }
 0x7be   : > { %v3417_v44 = vpop.eup %3416 }
 0x7bf   : > { %v1318_v45 = vmul.f32 %v3417_v44, %v3409_v14  ;;  %v1669_v60 = vpop.permute.xlu0 %1668 }
 0x7c0   : > { %v1674_v61 = vsel %vm636_vm2, %v1669_v60, 0 }
 0x7c1   : > { %v1322_v47 = vpack.c.bf16 %v1318_v45, %v1318_v45 }
 0x7c3   : > { %3132 = vmatmul.mubr.msk.bf16.vlgmr.msra.gmra.mrb[24].mxu1 %vm636_vm2, %v1322_v47  ;;  %v1667_v62 = vpop.permute.xlu0 %1666 }
 0x7c4   : > { %3142 = vmatpush3.bf16.xpose.msra.mxu1 %v1524_v48  ;;  %3143 = vmatprep.mubr.msk.bf16.mxu1 %vm3527_vm1, %v3526_v22 }
 0x7c5   : > { %3153 = vmatprep.subr.bf16.mxu1 %v3526_v22 }
 0x7c6   : > { %v1311_v49 = vpop.xlane.xlu1 %1310 }
 0x7c7   : > { %3418 = vrcp.f32 %v1311_v49 }
 0x7ca   : > { %v1517_v50 = vpop.permute.xlu1 %1516 }
 0x7cb   : > { %3144 = vmatmul.mubr.msk.bf16.vlgmr.msra.gmra.mrb[28].mxu1 %vm636_vm2, %v1517_v50 }
 0x7cc   : > { %3155 = vmatprep.mubr.msk.bf16.mxu1 %vm3527_vm1, %v3526_v22 }
 0x7ce   : > { %v1619_v51 = vpop.permute.xlu1 %1618 }
 0x7cf   : > { %v1624_v53 = vsel %vm636_vm2, %v1619_v51, 0 }
 0x7d0   : > { %3154 = vmatpush3.bf16.xpose.msra.mxu1 %v1624_v53 }
 0x7d1   : > { %v3419_v54 = vpop.eup %3418  ;;  %3165 = vmatprep.subr.bf16.mxu1 %v3526_v22 }
 0x7d2   : > { %v1319_v55 = vmul.f32 %v3419_v54, %v3411_v19  ;;  %v1617_v59 = vpop.permute.xlu1 %1616 }
 0x7d4   : > { %v1323_v56 = vpack.c.bf16 %v1319_v55, %v1319_v55 }
 0x7d6   : > { %3138 = vmatmul.mubr.msk.bf16.vlgmr.msra.gmra.mrb[36].mxu0 %vm636_vm2, %v1323_v56 }
 0x7d7   : > { %3148 = vmatpush3.bf16.xpose.msra.mxu0 %v1574_v58  ;;  %3156 = vmatmul.mubr.msk.bf16.vlgmr.msra.gmra.mrb[32].mxu1 %vm636_vm2, %v1617_v59 }
 0x7d8   : > { %3149 = vmatprep.mubr.msk.bf16.mxu0 %vm3527_vm1, %v3526_v22  ;;  %3159 = vmatprep.subr.bf16.mxu0 %v3526_v22 }
 0x7d9   : > { %3167 = vmatprep.mubr.msk.bf16.mxu1 %vm3527_vm1, %v3526_v22 }
 0x7de   : > { %3150 = vmatmul.mubr.msk.bf16.vlgmr.msra.gmra.mrb[40].mxu0 %vm636_vm2, %v1567_v57 }
 0x7df   : > { %3160 = vmatpush3.bf16.xpose.msra.mxu0 %v1674_v61  ;;  %3161 = vmatprep.mubr.msk.bf16.mxu0 %vm3527_vm1, %v3526_v22 }
 0x7e0   : > { %3171 = vmatprep.subr.bf16.mxu0 %v3526_v22 }
 0x7e6   : > { %3162 = vmatmul.mubr.msk.bf16.vlgmr.msra.gmra.mrb[44].mxu0 %vm636_vm2, %v1667_v62 }
 0x7e7   : > { %3173 = vmatprep.mubr.msk.bf16.mxu0 %vm3527_vm1, %v3526_v22 }
 0x861   : > { %v3875_v63 = vpop.f32.mrb[20].mxu1 }
 0x862   : > { %v3121_v0 = vpop.f32.mrb[21].mxu1 }
 0x863   : > { %v1369_v1 = vpop.f32.mrb[22].mxu1 }
 0x864   : > { %v3122_v2 = vpop.f32.mrb[23].mxu1 }
 0x874   : > { %v3877_v3 = vpop.f32.mrb[32].mxu0 }
 0x875   : > { %v3336_v4 = vpack.i.bf16 %v3877_v3, %v3875_v63  ;;  %v3127_v5 = vpop.f32.mrb[33].mxu0 }
 0x876   : > { %v1417_v6 = vpop.f32.mrb[34].mxu0 }
 0x877   : > { %v3128_v7 = vpop.f32.mrb[35].mxu0 }
 0x896   : > { %v3881_v8 = vpop.f32.mrb[24].mxu1 }
 0x897   : > { %v3133_v10 = vpop.f32.mrb[25].mxu1 }
 0x898   : > { %v1465_v11 = vpop.f32.mrb[26].mxu1 }
 0x899   : > { %v3134_v12 = vpop.f32.mrb[27].mxu1 }
 0x89e   : > { %v1560_v14 = vpop.f32.mrb[28].mxu1 }
 0x89f   : > { %v1716_v15 = vmul.f32 0.35355338, %v1560_v14  ;;  %v3145_v16 = vpop.f32.mrb[29].mxu1 }
 0x8a0   : > { %v1563_v18 = vpop.f32.mrb[30].mxu1 }
 0x8a1   : > { %v3146_v19 = vpop.f32.mrb[31].mxu1  ;;  %v1720_v20 = vsel %vm636_vm2, %v1716_v15, -inf }
 0x8a2   : > { %1721 = vmax.xlane.f32.xlu1 %v1720_v20 }
 0x8a9   : > { %v3884_v21 = vpop.f32.mrb[36].mxu0 }
 0x8aa   : > { %v3341_v24 = vpack.i.bf16 %v3884_v21, %v3881_v8  ;;  %v3139_v25 = vpop.f32.mrb[37].mxu0  ;;  %v1660_v26 = vpop.f32.mrb[32].mxu1 }
 0x8ab   : > { %v1513_v27 = vpop.f32.mrb[38].mxu0  ;;  %v3157_v29 = vpop.f32.mrb[33].mxu1  ;;  %v1718_v44 = vmul.f32 0.35355338, %v1660_v26 }
 0x8ac   : > { %v3140_v32 = vpop.f32.mrb[39].mxu0  ;;  %v1663_v33 = vpop.f32.mrb[34].mxu1 }
 0x8ad   : > { %v3158_v34 = vpop.f32.mrb[35].mxu1  ;;  %v1726_v47 = vsel %vm636_vm2, %v1718_v44, -inf }
 0x8b1   : > { %v1610_v40 = vpop.f32.mrb[40].mxu0 }
 0x8b2   : > { %v1717_v41 = vmul.f32 0.35355338, %v1610_v40  ;;  %v3151_v42 = vpop.f32.mrb[41].mxu0 }
 0x8b3   : > { %1816 = vrot.lane.b32.xlu1 %v3705_v35, %s3535_s12  ;;  %v1613_v43 = vpop.f32.mrb[42].mxu0 }
 0x8b4   : > { %v3152_v45 = vpop.f32.mrb[43].mxu0  ;;  %v1723_v46 = vsel %vm636_vm2, %v1717_v41, -inf }
 0x8b5   : > { %1724 = vmax.xlane.f32.xlu0 %v1723_v46 }
 0x8b9   : > { %1727 = vmax.xlane.f32.xlu0 %v1726_v47  ;;  %v1710_v48 = vpop.f32.mrb[44].mxu0 }
 0x8ba   : > { %v3163_v49 = vpop.f32.mrb[45].mxu0  ;;  %v1719_v52 = vmul.f32 0.35355338, %v1710_v48 }
 0x8bb   : > { %v1713_v50 = vpop.f32.mrb[46].mxu0 }
 0x8bc   : > { %v3164_v51 = vpop.f32.mrb[47].mxu0  ;;  %v1729_v53 = vsel %vm636_vm2, %v1719_v52, -inf }
 0x8cf   : > { %1768 = vrot.lane.b32.xlu0 %v3703_v31, %s3535_s12 }
 0x8d7   : > { %1730 = vmax.xlane.f32.xlu1 %v1729_v53 }
 0x8e8   : > { %1864 = vrot.lane.b32.xlu1 %v3711_v37, %s3535_s12 }
 0x92f   : > { %v1722_v54 = vpop.xlane.xlu1 %1721 }
 0x930   : > { %v1732_v55 = vsub.f32 %v1716_v15, %v1722_v54 }
 0x932   : > { %v1736_v56 = vmul.f32 1.442695, %v1732_v55 }
 0x933   : > { %v1817_v57 = vpop.permute.xlu1 %1816 }
 0x934   : > { %3420 = vpow2.f32 %v1736_v56  ;;  %v1822_v58 = vsel %vm884_vm3, %v1817_v57, 0 }
 0x935   : > { %3172 = vmatpush3.bf16.msra.mxu0 %v1822_v58 }
 0x936   : > { %3183 = vmatprep.subr.bf16.mxu0 %v3526_v22 }
 0x93e   : > { %v3421_v59 = vpop.eup %3420 }
 0x93f   : > { %v1744_v60 = vsel %vm636_vm2, %v3421_v59, 0.0 }
 0x940   : > { %1745 = vadd.xlane.f32.xlu0 %v1744_v60 }
 0x942   : > { %v1725_v61 = vpop.xlane.xlu0 %1724 }
 0x943   : > { %v1733_v62 = vsub.f32 %v1717_v41, %v1725_v61 }
 0x945   : > { %v1738_v0 = vmul.f32 1.442695, %v1733_v62 }
 0x946   : > { %v1728_v1 = vpop.xlane.xlu0 %1727 }
 0x947   : > { %3422 = vpow2.f32 %v1738_v0  ;;  %v1734_v10 = vsub.f32 %v1718_v44, %v1728_v1 }
 0x949   : > { %v1740_v11 = vmul.f32 1.442695, %v1734_v10 }
 0x94a   : > { %v1769_v2 = vpop.permute.xlu0 %1768 }
 0x94b   : > { %v1774_v5 = vsel %vm884_vm3, %v1769_v2, 0  ;;  %3424 = vpow2.f32 %v1740_v11 }
 0x94c   : > { %3166 = vmatpush3.bf16.msra.mxu1 %v1774_v5 }
 0x94d   : > { %3177 = vmatprep.subr.bf16.mxu1 %v3526_v22 }
 0x951   : > { %v3423_v6 = vpop.eup %3422 }
 0x952   : > { %v1747_v7 = vsel %vm636_vm2, %v3423_v6, 0.0 }
 0x953   : > { %1748 = vadd.xlane.f32.xlu1 %v1747_v7 }
 0x955   : > { %v3425_v14 = vpop.eup %3424 }
 0x956   : > { %1912 = vrot.lane.b32.xlu0 %v3708_v36, %s3535_s12  ;;  %v1750_v16 = vsel %vm636_vm2, %v3425_v14, 0.0  ;;  %s3541_s12 = smov 24  }
 0x964   : > { %1962 = vrot.lane.b32.xlu1 %v3703_v31, %s3536_s13  ;;  %v1731_v12 = vpop.xlane.xlu1 %1730 }
 0x965   : > { %v1735_v15 = vsub.f32 %v1719_v52, %v1731_v12 }
 0x967   : > { %v1742_v18 = vmul.f32 1.442695, %v1735_v15 }
 0x968   : > { %v1865_v29 = vpop.permute.xlu1 %1864 }
 0x969   : > { %3426 = vpow2.f32 %v1742_v18  ;;  %v1870_v33 = vsel %vm884_vm3, %v1865_v29, 0 }
 0x973   : > { %v3427_v19 = vpop.eup %3426 }
 0x974   : > { %v1753_v20 = vsel %vm636_vm2, %v3427_v19, 0.0 }
 0x975   : > { %1751 = vadd.xlane.f32.xlu0 %v1750_v16 }
 0x988   : > { %1754 = vadd.xlane.f32.xlu1 %v1753_v20 }
 0x98b   : > { %2012 = vrot.lane.b32.xlu0 %v3705_v35, %s3536_s13 }
 0x98f   : > { %2010 = vrot.lane.b32.xlu0 %v3705_v35, %s3537_s14 }
 0x993   : > { %2112 = vrot.lane.b32.xlu0 %v3708_v36, %s3536_s13 }
 0x997   : > { %2110 = vrot.lane.b32.xlu0 %v3708_v36, %s3537_s14 }
 0x999   : > { %1960 = vrot.lane.b32.xlu1 %v3703_v31, %s3537_s14 }
 0x99d   : > { %2062 = vrot.lane.b32.xlu1 %v3711_v37, %s3536_s13  ;;  %s3542_s13 = smov [#allocation2]  }
 0x9a1   : > { %2060 = vrot.lane.b32.xlu1 %v3711_v37, %s3537_s14  ;;  %s2950_s14 = sshll.u32 %s3625_s21, 9  ;;  %s4122_s21 = scalar_lea.sflag [#allocation3], %s378_s29 }
 0x9cd   : > { %v1746_v25 = vpop.xlane.xlu0 %1745 }
 0x9ce   : > { %3428 = vrcp.f32 %v1746_v25 }
 0x9d1   : > { %v1913_v42 = vpop.permute.xlu0 %1912 }
 0x9d2   : > { %v1918_v44 = vsel %vm884_vm3, %v1913_v42, 0 }
 0x9d8   : > { %v3429_v26 = vpop.eup %3428 }
 0x9d9   : > { %v1760_v27 = vmul.f32 %v3429_v26, %v3421_v59 }
 0x9db   : > { %v1764_v32 = vpack.c.bf16 %v1760_v27, %v1760_v27 }
 0x9dd   : > { %3168 = vmatmul.mubr.msk.bf16.vlgmr.msra.gmra.mrb[36].mxu1 %vm636_vm2, %v1764_v32 }
 0x9de   : > { %3178 = vmatpush3.bf16.msra.mxu1 %v1870_v33  ;;  %3179 = vmatprep.mubr.msk.bf16.mxu1 %vm3527_vm1, %v3526_v22 }
 0x9df   : > { %3189 = vmatprep.subr.bf16.mxu1 %v3526_v22 }
 0x9e0   : > { %v1749_v34 = vpop.xlane.xlu1 %1748 }
 0x9e1   : > { %3430 = vrcp.f32 %v1749_v34 }
 0x9e4   : > { %v1963_v48 = vpop.permute.xlu1 %1962 }
 0x9e5   : > { %v1968_v50 = vsel %vm636_vm2, %v1963_v48, 0 }
 0x9eb   : > { %v3431_v40 = vpop.eup %3430 }
 0x9ec   : > { %v1761_v41 = vmul.f32 %v3431_v40, %v3423_v6 }
 0x9ee   : > { %v1765_v43 = vpack.c.bf16 %v1761_v41, %v1761_v41 }
 0x9f0   : > { %3174 = vmatmul.mubr.msk.bf16.vlgmr.msra.gmra.mrb[48].mxu0 %vm636_vm2, %v1765_v43 }
 0x9f1   : > { %3184 = vmatpush3.bf16.msra.mxu0 %v1918_v44  ;;  %3185 = vmatprep.mubr.msk.bf16.mxu0 %vm3527_vm1, %v3526_v22 }
 0x9f2   : > { %3195 = vmatprep.subr.bf16.mxu0 %v3526_v22 }
 0xa02   : > { %v1752_v45 = vpop.xlane.xlu0 %1751 }
 0xa03   : > { %3432 = vrcp.f32 %v1752_v45 }
 0xa06   : > { %v2013_v54 = vpop.permute.xlu0 %2012 }
 0xa07   : > { %v2018_v60 = vsel %vm636_vm2, %v2013_v54, 0 }
 0xa0a   : > { %v2011_v59 = vpop.permute.xlu0 %2010 }
 0xa0d   : > { %v3433_v46 = vpop.eup %3432 }
 0xa0e   : > { %v1762_v47 = vmul.f32 %v3433_v46, %v3425_v14  ;;  %v2113_v62 = vpop.permute.xlu0 %2112 }
 0xa0f   : > { %v2118_v0 = vsel %vm636_vm2, %v2113_v62, 0 }
 0xa10   : > { %v1766_v49 = vpack.c.bf16 %v1762_v47, %v1762_v47 }
 0xa12   : > { %3180 = vmatmul.mubr.msk.bf16.vlgmr.msra.gmra.mrb[40].mxu1 %vm636_vm2, %v1766_v49  ;;  %v2111_v1 = vpop.permute.xlu0 %2110 }
 0xa13   : > { %3190 = vmatpush3.bf16.xpose.msra.mxu1 %v1968_v50  ;;  %3191 = vmatprep.mubr.msk.bf16.mxu1 %vm3527_vm1, %v3526_v22 }
 0xa14   : > { %3201 = vmatprep.subr.bf16.mxu1 %v3526_v22 }
 0xa15   : > { %v1755_v51 = vpop.xlane.xlu1 %1754 }
 0xa16   : > { %3434 = vrcp.f32 %v1755_v51 }
 0xa19   : > { %v1961_v52 = vpop.permute.xlu1 %1960 }
 0xa1a   : > { %3192 = vmatmul.mubr.msk.bf16.vlgmr.msra.gmra.mrb[44].mxu1 %vm636_vm2, %v1961_v52 }
 0xa1b   : > { %3203 = vmatprep.mubr.msk.bf16.mxu1 %vm3527_vm1, %v3526_v22 }
 0xa1d   : > { %v2063_v53 = vpop.permute.xlu1 %2062 }
 0xa1e   : > { %v2068_v55 = vsel %vm636_vm2, %v2063_v53, 0 }
 0xa1f   : > { %3202 = vmatpush3.bf16.xpose.msra.mxu1 %v2068_v55 }
 0xa20   : > { %v3435_v56 = vpop.eup %3434  ;;  %3213 = vmatprep.subr.bf16.mxu1 %v3526_v22 }
 0xa21   : > { %v1763_v57 = vmul.f32 %v3435_v56, %v3427_v19  ;;  %v2061_v61 = vpop.permute.xlu1 %2060 }
 0xa23   : > { %v1767_v58 = vpack.c.bf16 %v1763_v57, %v1763_v57 }
 0xa25   : > { %3186 = vmatmul.mubr.msk.bf16.vlgmr.msra.gmra.mrb[52].mxu0 %vm636_vm2, %v1767_v58 }
 0xa26   : > { %3196 = vmatpush3.bf16.xpose.msra.mxu0 %v2018_v60  ;;  %3204 = vmatmul.mubr.msk.bf16.vlgmr.msra.gmra.mrb[48].mxu1 %vm636_vm2, %v2061_v61 }
 0xa27   : > { %3197 = vmatprep.mubr.msk.bf16.mxu0 %vm3527_vm1, %v3526_v22  ;;  %3207 = vmatprep.subr.bf16.mxu0 %v3526_v22 }
 0xa28   : > { %3215 = vmatprep.mubr.msk.bf16.mxu1 %vm3527_vm1, %v3526_v22 }
 0xa2d   : > { %3198 = vmatmul.mubr.msk.bf16.vlgmr.msra.gmra.mrb[56].mxu0 %vm636_vm2, %v2011_v59 }
 0xa2e   : > { %3208 = vmatpush3.bf16.xpose.msra.mxu0 %v2118_v0  ;;  %3209 = vmatprep.mubr.msk.bf16.mxu0 %vm3527_vm1, %v3526_v22 }
 0xa2f   : > { %3219 = vmatprep.subr.bf16.mxu0 %v3526_v22 }
 0xa35   : > { %3210 = vmatmul.mubr.msk.bf16.vlgmr.msra.gmra.mrb[60].mxu0 %vm636_vm2, %v2111_v1 }
 0xa36   : > { %3221 = vmatprep.mubr.msk.bf16.mxu0 %vm3527_vm1, %v3526_v22 }
 0xab0   : > { %v3951_v2 = vpop.f32.mrb[36].mxu1 }
 0xab1   : > { %v3169_v5 = vpop.f32.mrb[37].mxu1 }
 0xab2   : > { %v1813_v6 = vpop.f32.mrb[38].mxu1 }
 0xab3   : > { %v3170_v7 = vpop.f32.mrb[39].mxu1 }
 0xac3   : > { %v3953_v10 = vpop.f32.mrb[48].mxu0 }
 0xac4   : > { %v3346_v11 = vpack.i.bf16 %v3953_v10, %v3951_v2  ;;  %v3175_v12 = vpop.f32.mrb[49].mxu0 }
 0xac5   : > { %v1861_v14 = vpop.f32.mrb[50].mxu0 }
 0xac6   : > { %v3176_v15 = vpop.f32.mrb[51].mxu0 }
 0xae5   : > { %v3957_v16 = vpop.f32.mrb[40].mxu1 }
 0xae6   : > { %v3181_v18 = vpop.f32.mrb[41].mxu1 }
 0xae7   : > { %v1909_v19 = vpop.f32.mrb[42].mxu1 }
 0xae8   : > { %v3182_v20 = vpop.f32.mrb[43].mxu1 }
 0xaed   : > { %v2004_v25 = vpop.f32.mrb[44].mxu1 }
 0xaee   : > { %v2160_v26 = vmul.f32 0.35355338, %v2004_v25  ;;  %v3193_v27 = vpop.f32.mrb[45].mxu1 }
 0xaef   : > { %v2007_v29 = vpop.f32.mrb[46].mxu1 }
 0xaf0   : > { %v3194_v32 = vpop.f32.mrb[47].mxu1  ;;  %v2164_v33 = vsel %vm636_vm2, %v2160_v26, -inf }
 0xaf1   : > { %2165 = vmax.xlane.f32.xlu1 %v2164_v33 }
 0xaf8   : > { %v3960_v34 = vpop.f32.mrb[52].mxu0 }
 0xaf9   : > { %v3351_v40 = vpack.i.bf16 %v3960_v34, %v3957_v16  ;;  %v3187_v41 = vpop.f32.mrb[53].mxu0  ;;  %v2104_v42 = vpop.f32.mrb[48].mxu1 }
 0xafa   : > { %v1957_v43 = vpop.f32.mrb[54].mxu0  ;;  %v3205_v44 = vpop.f32.mrb[49].mxu1  ;;  %v2162_v52 = vmul.f32 0.35355338, %v2104_v42 }
 0xafb   : > { %v3188_v45 = vpop.f32.mrb[55].mxu0  ;;  %v2107_v46 = vpop.f32.mrb[50].mxu1 }
 0xafc   : > { %v3206_v47 = vpop.f32.mrb[51].mxu1  ;;  %v2170_v55 = vsel %vm636_vm2, %v2162_v52, -inf }
 0xb00   : > { %v2054_v48 = vpop.f32.mrb[56].mxu0 }
 0xb01   : > { %v2161_v49 = vmul.f32 0.35355338, %v2054_v48  ;;  %v3199_v50 = vpop.f32.mrb[57].mxu0 }
 0xb02   : > { %v2057_v51 = vpop.f32.mrb[58].mxu0 }
 0xb03   : > { %v3200_v53 = vpop.f32.mrb[59].mxu0  ;;  %v2167_v54 = vsel %vm636_vm2, %v2161_v49, -inf }
 0xb04   : > { %2168 = vmax.xlane.f32.xlu0 %v2167_v54 }
 0xb08   : > { %2171 = vmax.xlane.f32.xlu0 %v2170_v55  ;;  %v2154_v56 = vpop.f32.mrb[60].mxu0  ;;  %v3368_v55 = vld [vmem:[%s4169_s5] sm:$0xff]  }
 0xb09   : > { %v2163_v57 = vmul.f32 0.35355338, %v2154_v56  ;;  %v3211_v58 = vpop.f32.mrb[61].mxu0 }
 0xb0a   : > { %v2157_v59 = vpop.f32.mrb[62].mxu0 }
 0xb0b   : > { %v3212_v60 = vpop.f32.mrb[63].mxu0  ;;  %v2173_v61 = vsel %vm636_vm2, %v2163_v57, -inf }
 0xb0c   : > { %2174 = vmax.xlane.f32.xlu1 %v2173_v61 }
 0xb1d   : > { %2260 = vrot.lane.b32.xlu1 %v3705_v35, %s3538_s15 }
 0xb1e   : > { %2212 = vrot.lane.b32.xlu0 %v3703_v31, %s3538_s15 }
 0xb7e   : > { %v2166_v62 = vpop.xlane.xlu1 %2165 }
 0xb7f   : > { %v2176_v0 = vsub.f32 %v2160_v26, %v2166_v62 }
 0xb81   : > { %v2180_v1 = vmul.f32 1.442695, %v2176_v0 }
 0xb83   : > { %3436 = vpow2.f32 %v2180_v1 }
 0xb8d   : > { %v3437_v5 = vpop.eup %3436 }
 0xb8e   : > { %v2188_v6 = vsel %vm636_vm2, %v3437_v5, 0.0 }
 0xb8f   : > { %2189 = vadd.xlane.f32.xlu0 %v2188_v6 }
 0xb91   : > { %v2169_v7 = vpop.xlane.xlu0 %2168 }
 0xb92   : > { %v2177_v12 = vsub.f32 %v2161_v49, %v2169_v7 }
 0xb94   : > { %v2182_v14 = vmul.f32 1.442695, %v2177_v12 }
 0xb95   : > { %v2172_v15 = vpop.xlane.xlu0 %2171 }
 0xb96   : > { %3438 = vpow2.f32 %v2182_v14  ;;  %v2178_v18 = vsub.f32 %v2162_v52, %v2172_v15 }
 0xb98   : > { %v2184_v19 = vmul.f32 1.442695, %v2178_v18 }
 0xb99   : > { %v2175_v20 = vpop.xlane.xlu1 %2174  ;;  %v2213_v35 = vpop.permute.xlu0 %2212 }
 0xb9a   : > { %3440 = vpow2.f32 %v2184_v19  ;;  %v2179_v25 = vsub.f32 %v2163_v57, %v2175_v20  ;;  %v2218_v31 = vsel %vm884_vm3, %v2213_v35, 0 }
 0xb9b   : > { %3214 = vmatpush3.bf16.msra.mxu1 %v2218_v31 }
 0xb9c   : > { %v2186_v26 = vmul.f32 1.442695, %v2179_v25  ;;  %3225 = vmatprep.subr.bf16.mxu1 %v3526_v22 }
 0xb9d   : > { %v2261_v27 = vpop.permute.xlu1 %2260 }
 0xb9e   : > { %3442 = vpow2.f32 %v2186_v26  ;;  %v2266_v29 = vsel %vm884_vm3, %v2261_v27, 0 }
 0xb9f   : > { %3220 = vmatpush3.bf16.msra.mxu0 %v2266_v29 }
 0xba0   : > { %v3439_v32 = vpop.eup %3438  ;;  %3231 = vmatprep.subr.bf16.mxu0 %v3526_v22 }
 0xba1   : > { %v2191_v33 = vsel %vm636_vm2, %v3439_v32, 0.0 }
 0xba2   : > { %2192 = vadd.xlane.f32.xlu1 %v2191_v33 }
 0xba4   : > { %v3441_v41 = vpop.eup %3440 }
 0xba5   : > { %v2194_v42 = vsel %vm636_vm2, %v3441_v41, 0.0 }
 0xba6   : > { %2195 = vadd.xlane.f32.xlu0 %v2194_v42 }
 0xba8   : > { %v3443_v43 = vpop.eup %3442 }
 0xba9   : > { %v2197_v44 = vsel %vm636_vm2, %v3443_v43, 0.0 }
 0xbaa   : > { %2198 = vadd.xlane.f32.xlu1 %v2197_v44 }
 0xbbb   : > { %2308 = vrot.lane.b32.xlu1 %v3711_v37, %s3538_s15 }
 0xbbc   : > { %2356 = vrot.lane.b32.xlu0 %v3708_v36, %s3538_s15  ;;  %s380_s15 = scalar_lea.vmem [#allocation2], %s2877_s30 }
 0xbbf   : > { %3337 = vrot.lane.b32.xlu1 %v3336_v4, %s4176_s16 }
 0xbc0   : > { %3342 = vrot.lane.b32.xlu0 %v3341_v24, %s4176_s16 }
 0xbc3   : > { %3347 = vrot.lane.b32.xlu1 %v3346_v11, %s3540_s22 }
 0xbc4   : > { %3352 = vrot.lane.b32.xlu0 %v3351_v40, %s3540_s22  ;;  %s2811_s22 = sshll.u32 %s380_s15, 4  ;;  %s4118_s22 = int_to_ptr.vmem [resolvable:$true] %s2811_s22 }
 0xbc5   : > { %s3460_s30 = scalar_lea.vmem %s4118_s22, 512 }
 0xbc6   : > { %p3461_p11 = scmp.ne.s32.totalorder %s4118_s22, %s3460_s30 }
 0xbc8   : > { %p3462_p12 = pnand %p3461_p11, %p3642_p5 }
 0xbca   : > { %p3463_p13 = pneg %p3462_p12 }
 0xc1c   : > { %v2190_v36 = vpop.xlane.xlu0 %2189 }
 0xc1d   : > { %3444 = vrcp.f32 %v2190_v36 }
 0xc27   : > { %v3445_v37 = vpop.eup %3444 }
 0xc28   : > { %v2204_v45 = vmul.f32 %v3445_v37, %v3437_v5 }
 0xc2a   : > { %v2208_v63 = vpack.c.bf16 %v2204_v45, %v2204_v45 }
 0xc2c   : > { %3216 = vmatmul.mubr.msk.bf16.vlgmr.msra.gmra.mrb[52].mxu1 %vm636_vm2, %v2208_v63 }
 0xc2d   : > { %3227 = vmatprep.mubr.msk.bf16.mxu1 %vm3527_vm1, %v3526_v22 }
 0xc2f   : > { %v2193_v3 = vpop.xlane.xlu1 %2192 }
 0xc30   : > { %3446 = vrcp.f32 %v2193_v3 }
 0xc33   : > { %v2196_v4 = vpop.xlane.xlu0 %2195 }
 0xc34   : > { %3448 = vrcp.f32 %v2196_v4 }
 0xc37   : > { %v2199_v8 = vpop.xlane.xlu1 %2198  ;;  %v2357_v10 = vpop.permute.xlu0 %2356 }
 0xc38   : > { %3450 = vrcp.f32 %v2199_v8  ;;  %v2362_v46 = vsel %vm884_vm3, %v2357_v10, 0 }
 0xc3a   : > { %v3447_v21 = vpop.eup %3446 }
 0xc3b   : > { %v2205_v24 = vmul.f32 %v3447_v21, %v3439_v32  ;;  %v2309_v2 = vpop.permute.xlu1 %2308  ;;  %v3343_v19 = vpop.permute.xlu0 %3342 }
 0xc3c   : > { %v2314_v11 = vsel %vm884_vm3, %v2309_v2, 0  ;;  %v3345_v45 = vunpack.i.h.bf16 %v3343_v19  ;;  %v3344_v63 = vunpack.i.l.bf16 %v3343_v19 }
 0xc3d   : > { %3226 = vmatpush3.bf16.msra.mxu1 %v2314_v11  ;;  %v2209_v16 = vpack.c.bf16 %v2205_v24, %v2205_v24 }
 0xc3e   : > { %v3449_v34 = vpop.eup %3448  ;;  %3237 = vmatprep.subr.bf16.mxu1 %v3368_v55  ;;  %v2454_v8 = vsel %vm636_vm2, %v3807_v17, %v3344_v63 }
 0xc3f   : > { %v2206_v40 = vmul.f32 %v3449_v34, %v3441_v41  ;;  %3222 = vmatmul.mubr.msk.bf16.vlgmr.msra.gmra.mrb[64].mxu0 %vm636_vm2, %v2209_v16  ;;  %v3338_v15 = vpop.permute.xlu1 %3337 }
 0xc40   : > { %3232 = vmatpush3.bf16.msra.mxu0 %v2362_v46  ;;  %3233 = vmatprep.mubr.msk.bf16.mxu0 %vm3527_vm1, %v3526_v22  ;;  %v3369_v22 = vld [vmem:[%s4169_s5 + $0x8] sm:$0xff]   ;;  %v3340_v20 = vunpack.i.h.bf16 %v3338_v15  ;;  %v3339_v35 = vunpack.i.l.bf16 %v3338_v15 }
 0xc41   : > { %v2210_v47 = vpack.c.bf16 %v2206_v40, %v2206_v40 }
 0xc42   : > { %v3451_v48 = vpop.eup %3450  ;;  %v2453_v27 = vsel %vm636_vm2, %v3803_v9, %v3340_v20  ;;  %v2452_v29 = vsel %vm636_vm2, %v3805_v13, %v3339_v35  ;;  %v2455_v13 = vsel %vm636_vm2, %v3810_v30, %v3345_v45  ;;  %v2926_v30 = vld [vmem:[%s4170_s6] ss:$0 sm:$0xff] }
 0xc43   : > { %v2207_v49 = vmul.f32 %v3451_v48, %v3443_v43  ;;  %3228 = vmatmul.mubr.msk.bf16.vlgmr.msra.gmra.mrb[56].mxu1 %vm636_vm2, %v2210_v47  ;;  %v3348_v18 = vpop.permute.xlu1 %3347  ;;  %v3353_v43 = vpop.permute.xlu0 %3352 }
 0xc44   : > { %3238 = vmatpush3.bf16.msra.mxu1 %v3368_v55  ;;  %v3350_v25 = vunpack.i.h.bf16 %v3348_v18  ;;  %v3349_v31 = vunpack.i.l.bf16 %v3348_v18  ;;  %v3355_v3 = vunpack.i.h.bf16 %v3353_v43  ;;  %v3354_v4 = vunpack.i.l.bf16 %v3353_v43 }
 0xc45   : > { %v2211_v50 = vpack.c.bf16 %v2207_v49, %v2207_v49  ;;  %3239 = vmatprep.subr.bf16.mxu1 %v3369_v22 }
 0xc46   : > { %v2457_v41 = vsel %vm2456_vm4, %v2452_v29, %v3349_v31  ;;  %v2458_v42 = vsel %vm2456_vm4, %v2453_v27, %v3350_v25  ;;  %v2459_v2 = vsel %vm2456_vm4, %v2454_v8, %v3354_v4  ;;  %v2460_v10 = vsel %vm2456_vm4, %v2455_v13, %v3355_v3  ;;  %v3370_v25 = vld [vmem:[%s4171_s7] sm:$0xff]   ;;  %v3371_v31 = vld [vmem:[%s4171_s7 + $0x8] sm:$0xff]   ;;  %v3374_v29 = vld [vmem:[%s4173_s9 + $0x10] sm:$0xff]  }
 0xc47   : > { %3234 = vmatmul.mubr.msk.bf16.vlgmr.msra.gmra.mrb[68].mxu0 %vm636_vm2, %v2211_v50  ;;  %3245 = vmatprep.subr.bf16.mxu0 %v3370_v25  ;;  %v3373_v27 = vld [vmem:[%s4173_s9 + $0x8] sm:$0xff]  }
 0xc48   : > { %3240 = vmatpush3.bf16.msra.mxu1 %v3369_v22  ;;  %3246 = vmatpush3.bf16.msra.mxu0 %v3370_v25 }
 0xc49   : > { %3247 = vmatprep.subr.bf16.mxu0 %v3371_v31 }
 0xc4c   : > { %3248 = vmatpush3.bf16.msra.mxu0 %v3371_v31 }
 0xcff   : > { %v2254_v51 = vpop.f32.mrb[52].mxu1 }
 0xd00   : > { %v3217_v52 = vpop.f32.mrb[53].mxu1 }
 0xd01   : > { %v2257_v53 = vpop.f32.mrb[54].mxu1 }
 0xd02   : > { %v3218_v54 = vpop.f32.mrb[55].mxu1 }
 0xd12   : > { %v2302_v56 = vpop.f32.mrb[64].mxu0 }
 0xd13   : > { %v3356_v57 = vpack.i.bf16 %v2302_v56, %v2254_v51  ;;  %v3223_v58 = vpop.f32.mrb[65].mxu0 }
 0xd14   : > { %v2305_v59 = vpop.f32.mrb[66].mxu0 }
 0xd15   : > { %v3224_v60 = vpop.f32.mrb[67].mxu0  ;;  %3357 = vrot.lane.b32.xlu1 %v3356_v57, %s3541_s12 }
 0xd16   : > { %v2350_v61 = vpop.f32.mrb[56].mxu1 }
 0xd17   : > { %v3229_v62 = vpop.f32.mrb[57].mxu1 }
 0xd18   : > { %v2353_v0 = vpop.f32.mrb[58].mxu1 }
 0xd19   : > { %v3230_v1 = vpop.f32.mrb[59].mxu1 }
 0xd1a   : > { %v2398_v5 = vpop.f32.mrb[68].mxu0 }
 0xd1b   : > { %v3361_v6 = vpack.i.bf16 %v2398_v5, %v2350_v61  ;;  %v3235_v7 = vpop.f32.mrb[69].mxu0 }
 0xd1c   : > { %v2401_v12 = vpop.f32.mrb[70].mxu0 }
 0xd1d   : > { %3362 = vrot.lane.b32.xlu0 %v3361_v6, %s3541_s12  ;;  %v3236_v14 = vpop.f32.mrb[71].mxu0  ;;  %s4115_s12 = scalar_lea.hbm %s4175_s11, %s2950_s14  ;;  %s3464_s14 = sshll.u32 %s3542_s13, 4  ;;  %s3465_s14 = int_to_ptr.vmem [resolvable:$false] %s3464_s14 }
 0xd1e   : > { %s3466_s24 = scalar_lea.vmem %s3465_s14, 1024  ;;  %p3467_p0 = scmp.lt.s32.totalorder %s4118_s22, %s3465_s14 }
 0xd1f   : > { %p3468_p1 = scmp.lt.s32.totalorder %s3466_s24, %s3460_s30 }
 0xd21   : > { %p3469_p2 = por %p3468_p1, %p3467_p0 }
 0xd23   : > { %p3470_p3 = pnand %p3469_p2, %p3463_p13 }
 0xd87   : > { %v3358_v26 = vpop.permute.xlu1 %3357 }
 0xd88   : > { %v3360_v32 = vunpack.i.h.bf16 %v3358_v26  ;;  %v3359_v33 = vunpack.i.l.bf16 %v3358_v26  ;;  %v3372_v26 = vld [vmem:[%s4173_s9] sm:$0xff]  }
 0xd89   : > { %3253 = vmatprep.subr.bf16.mxu1 %v3372_v26 }
 0xd8a   : > { %v2463_v44 = vsel %vm2461_vm5, %v2458_v42, %v3360_v32  ;;  %v2462_v36 = vsel %vm2461_vm5, %v2457_v41, %v3359_v33  ;;  %v3375_v32 = vld [vmem:[%s4173_s9 + $0x18] sm:$0xff]   ;;  %v3376_v33 = vld [vmem:[%s4173_s9 + $0x20] sm:$0xff]   ;;  %v3377_v41 = vld [vmem:[%s4173_s9 + $0x28] sm:$0xff]  }
 0xd8b   : > { %v2466_v37 = vpack.c.bf16 %v2463_v44, %v2462_v36 }
 0xd8d   : > { %3241 = vmatprep.mubr.msk.bf16.mxu1 %vm493_vm0, %v2466_v37 }
 0xd8f   : > { %v3363_v9 = vpop.permute.xlu0 %3362 }
 0xd90   : > { %v3365_v21 = vunpack.i.h.bf16 %v3363_v9  ;;  %v3364_v24 = vunpack.i.l.bf16 %v3363_v9 }
 0xd92   : > { %v2464_v11 = vsel %vm2461_vm5, %v2459_v2, %v3364_v24  ;;  %v2465_v16 = vsel %vm2461_vm5, %v2460_v10, %v3365_v21 }
 0xd93   : > { %v2467_v34 = vpack.c.bf16 %v2465_v16, %v2464_v11 }
 0xd95   : > { %3242 = vmatmul.mubr.msk.bf16.vlgmr.msra.gmra.mrb[60].mxu1 %vm493_vm0, %v2467_v34 }
 0xd96   : > { %3254 = vmatpush3.bf16.msra.mxu1 %v3372_v26 }
 0xd97   : > { %3255 = vmatprep.subr.bf16.mxu1 %v3373_v27 }
 0xd9a   : > { %3256 = vmatpush3.bf16.msra.mxu1 %v3373_v27 }
 0xd9b   : > { %3257 = vmatprep.subr.bf16.mxu1 %v3374_v29 }
 0xd9e   : > { %3258 = vmatpush3.bf16.msra.mxu1 %v3374_v29 }
 0xd9f   : > { %3259 = vmatprep.subr.bf16.mxu1 %v3375_v32 }
 0xda2   : > { %3260 = vmatpush3.bf16.msra.mxu1 %v3375_v32 }
 0xda3   : > { %3261 = vmatprep.subr.bf16.mxu1 %v3376_v33 }
 0xda6   : > { %3262 = vmatpush3.bf16.msra.mxu1 %v3376_v33 }
 0xda7   : > { %3263 = vmatprep.subr.bf16.mxu1 %v3377_v41 }
 0xdaa   : > { %3264 = vmatpush3.bf16.msra.mxu1 %v3377_v41 }
 0xe68   : > { %v3243_v40 = vpop.f32.mrb[60].mxu1 }
 0xe69   : > { %v2520_v46 = vpop.f32.mrb[61].mxu1  ;;  %v2537_v50 = vadd.f32 %v3243_v40, %v3670_v38 }
 0xe6a   : > { %v2535_v17 = vadd.f32 %v2520_v46, %v3662_v23  ;;  %v3244_v47 = vpop.f32.mrb[62].mxu1 }
 0xe6b   : > { %v2538_v48 = vadd.f32 %v3244_v47, %v3672_v39  ;;  %v2523_v49 = vpop.f32.mrb[63].mxu1  ;;  %v4046_v22 = vadd.f32 %v2926_v30, %v2537_v50  ;;  %v3379_v47 = vld [vmem:[%s4173_s9 + $0x38] sm:$0xff]  }
 0xe6c   : > { %v4037_v51 = vadd.f32 %v2926_v30, %v2535_v17  ;;  %v2536_v52 = vadd.f32 %v2523_v49, %v3666_v28  ;;  %v3378_v17 = vld [vmem:[%s4173_s9 + $0x30] sm:$0xff]  }
 0xe6d   : > { %v4040_v53 = vadd.f32 %v2926_v30, %v2538_v48  ;;  %v2555_v28 = vsel %vm493_vm0, %v4046_v22, 0.0  ;;  %3265 = vmatprep.subr.bf16.mxu1 %v3378_v17  ;;  %v2927_v48 = vld [vmem:[%s4172_s8] ss:$0 sm:$0xff] }
 0xe6e   : > { %v4042_v54 = vadd.f32 %v2926_v30, %v2536_v52  ;;  %v2549_v55 = vsel %vm493_vm0, %v4037_v51, 0.0  ;;  %3266 = vmatpush3.bf16.msra.mxu1 %v3378_v17 }
 0xe6f   : > { %2550 = vadd.xlane.f32.xlu1 %v2549_v55  ;;  %v2558_v38 = vsel %vm493_vm0, %v4040_v53, 0.0  ;;  %3267 = vmatprep.subr.bf16.mxu1 %v3379_v47 }
 0xe70   : > { %v2552_v23 = vsel %vm493_vm0, %v4042_v54, 0.0 }
 0xe71   : > { %2553 = vadd.xlane.f32.xlu0 %v2552_v23 }
 0xe72   : > { %3268 = vmatpush3.bf16.msra.mxu1 %v3379_v47 }
 0xe73   : > { %2559 = vadd.xlane.f32.xlu1 %v2558_v38 }
 0xe75   : > { %2556 = vadd.xlane.f32.xlu0 %v2555_v28 }
 0xefc   : > { %v2551_v39 = vpop.xlane.xlu1 %2550 }
 0xefd   : > { %v2561_v56 = vmul.f32 0.03125, %v2551_v39 }
 0xefe   : > { %v2554_v57 = vpop.xlane.xlu0 %2553 }
 0xeff   : > { %v4055_v58 = vsub.f32 %v4037_v51, %v2561_v56  ;;  %v2562_v59 = vmul.f32 0.03125, %v2554_v57 }
 0xf00   : > { %v2560_v60 = vpop.xlane.xlu1 %2559 }
 0xf01   : > { %v2566_v61 = vsub.f32 %v4042_v54, %v2562_v59  ;;  %v2564_v62 = vmul.f32 0.03125, %v2560_v60  ;;  %v2569_v0 = vmul.f32 %v4055_v58, %v4055_v58 }
 0xf02   : > { %v2557_v1 = vpop.xlane.xlu0 %2556 }
 0xf03   : > { %v2568_v5 = vsub.f32 %v4040_v53, %v2564_v62  ;;  %v2563_v6 = vmul.f32 0.03125, %v2557_v1  ;;  %v2573_v7 = vsel %vm493_vm0, %v2569_v0, 0.0  ;;  %v2570_v12 = vmul.f32 %v2566_v61, %v2566_v61  ;;  %v2940_v62 = vld [vmem:[%s4174_s10] ss:$0 sm:$0xff] }
 0xf04   : > { %2574 = vadd.xlane.f32.xlu0 %v2573_v7 }
 0xf05   : > { %v2567_v14 = vsub.f32 %v4046_v22, %v2563_v6  ;;  %v2576_v15 = vsel %vm493_vm0, %v2570_v12, 0.0  ;;  %v2572_v18 = vmul.f32 %v2568_v5, %v2568_v5 }
 0xf06   : > { %2577 = vadd.xlane.f32.xlu1 %v2576_v15 }
 0xf07   : > { %v2571_v19 = vmul.f32 %v2567_v14, %v2567_v14  ;;  %v2582_v20 = vsel %vm493_vm0, %v2572_v18, 0.0 }
 0xf09   : > { %v2579_v35 = vsel %vm493_vm0, %v2571_v19, 0.0 }
 0xf0a   : > { %2583 = vadd.xlane.f32.xlu1 %v2582_v20  ;;  %2580 = vadd.xlane.f32.xlu0 %v2579_v35 }
 0xf91   : > { %v2575_v42 = vpop.xlane.xlu0 %2574 }
 0xf92   : > { %v2585_v43 = vmul.f32 0.03125, %v2575_v42 }
 0xf93   : > { %v2578_v44 = vpop.xlane.xlu1 %2577 }
 0xf94   : > { %v2589_v36 = vadd.f32 1e-05, %v2585_v43  ;;  %v2586_v37 = vmul.f32 0.03125, %v2578_v44 }
 0xf96   : > { %3452 = vrsqrt.f32 %v2589_v36  ;;  %v2590_v45 = vadd.f32 1e-05, %v2586_v37 }
 0xf97   : > { %v2584_v63 = vpop.xlane.xlu1 %2583  ;;  %v2581_v3 = vpop.xlane.xlu0 %2580 }
 0xf98   : > { %3454 = vrsqrt.f32 %v2590_v45  ;;  %v2588_v4 = vmul.f32 0.03125, %v2584_v63  ;;  %v2587_v9 = vmul.f32 0.03125, %v2581_v3 }
 0xf9a   : > { %v2592_v13 = vadd.f32 1e-05, %v2588_v4  ;;  %v2591_v8 = vadd.f32 1e-05, %v2587_v9 }
 0xf9c   : > { %3456 = vrsqrt.f32 %v2592_v13 }
 0xf9d   : > { %3458 = vrsqrt.f32 %v2591_v8 }
 0xfa0   : > { %v3453_v21 = vpop.eup %3452 }
 0xfa1   : > { %v2597_v2 = vmul.f32 %v3453_v21, %v4055_v58 }
 0xfa2   : > { %v3455_v24 = vpop.eup %3454 }
 0xfa3   : > { %v2598_v10 = vmul.f32 %v3455_v24, %v2566_v61 }
 0xfa5   : > { %v2601_v11 = vpack.c.bf16 %v2598_v10, %v2597_v2 }
 0xfa6   : > { %v3457_v16 = vpop.eup %3456 }
 0xfa7   : > { %v3459_v34 = vpop.eup %3458  ;;  %v2600_v40 = vmul.f32 %v3457_v16, %v2568_v5  ;;  %3249 = vmatprep.mubr.msk.bf16.mxu0 %vm493_vm0, %v2601_v11 }
 0xfa8   : > { %v2599_v30 = vmul.f32 %v3459_v34, %v2567_v14 }
 0xfaa   : > { %v2602_v46 = vpack.c.bf16 %v2600_v40, %v2599_v30 }
 0xfac   : > { %3250 = vmatmul.mubr.msk.bf16.vlgmr.msra.gmra.mrb[72].mxu0 %vm493_vm0, %v2602_v46 }
0x107f   : > { %v3251_v49 = vpop.f32.mrb[72].mxu0 }
0x1080   : > { %v2670_v50 = vadd.f32 %v3251_v49, %v2927_v48  ;;  %v2661_v52 = vpop.f32.mrb[73].mxu0 }
0x1081   : > { %v2662_v55 = vadd.f32 %v2927_v48, %v2661_v52  ;;  %v3252_v23 = vpop.f32.mrb[74].mxu0 }
0x1082   : > { %v2673_v38 = vadd.f32 %v3252_v23, %v2927_v48  ;;  %v2664_v28 = vpop.f32.mrb[75].mxu0  ;;  %v2678_v56 = vmax.f32 %v2670_v50, 0.0 }
0x1083   : > { %v2665_v39 = vadd.f32 %v2927_v48, %v2664_v28  ;;  %v2676_v58 = vmax.f32 %v2662_v55, 0.0 }
0x1084   : > { %v2679_v57 = vmax.f32 %v2673_v38, 0.0 }
0x1085   : > { %v2677_v59 = vmax.f32 %v2665_v39, 0.0 }
0x1086   : > { %v2681_v60 = vpack.c.bf16 %v2679_v57, %v2678_v56 }
0x1087   : > { %v2680_v61 = vpack.c.bf16 %v2677_v59, %v2676_v58 }
0x1089   : > { %3269 = vmatprep.mubr.bf16.mxu1 %v2680_v61 }
0x108a   : > { %3270 = vmatmul.mubr.bf16.vlgmr.msra.gmra.mrb[64].mxu1 %v2681_v60 }
0x115d   : > { %v3271_v0 = vpop.f32.mrb[64].mxu1 }
0x115e   : > { %v2781_v1 = vadd.f32 %v3271_v0, %v4046_v22  ;;  %v2764_v5 = vpop.f32.mrb[65].mxu1 }
0x115f   : > { %v2779_v6 = vadd.f32 %v2764_v5, %v4037_v51  ;;  %v3272_v7 = vpop.f32.mrb[66].mxu1 }
0x1160   : > { %v2791_v12 = vadd.f32 %v2940_v62, %v2781_v1  ;;  %v2782_v14 = vadd.f32 %v3272_v7, %v4040_v53  ;;  %v2767_v15 = vpop.f32.mrb[67].mxu1 }
0x1161   : > { %v2789_v18 = vadd.f32 %v2940_v62, %v2779_v6  ;;  %v2780_v19 = vadd.f32 %v2767_v15, %v4042_v54 }
0x1162   : > { %2795 = vst.msk [vmem:[%s380_s15 + $0x10] sm:$0xff] %vm493_vm0, %v2791_v12  ;;  %v2792_v20 = vadd.f32 %v2940_v62, %v2782_v14 }
0x1163   : > { %2793 = vst.msk [vmem:[%s380_s15] sm:$0xff] %vm493_vm0, %v2789_v18  ;;  %v2790_v51 = vadd.f32 %v2940_v62, %v2780_v19 }
0x1164   : > { %2796 = vst.msk [vmem:[%s380_s15 + $0x18] sm:$0xff] %vm493_vm0, %v2792_v20 }
0x1165   : > { %2794 = vst.msk [vmem:[%s380_s15 + $0x8] sm:$0xff] %vm493_vm0, %v2790_v51 }
0x1166   : > { %3473 = shalt.err (!%p3470_p3)
}
0x1167   : > { %s3474_s29 = scalar_lea.hbm %s4115_s12, 512  ;;  %s3478_s13 = scalar_lea.hbm %s4175_s11, 1024 }
0x1168   : > { %p3475_p4 = scmp.ne.s32.totalorder %s4115_s12, %s3474_s29  ;;  %p3479_p9 = scmp.lt.u32.totalorder %s4115_s12, %s4175_s11 }
0x1169   : > { %p3480_p10 = scmp.lt.u32.totalorder %s3478_s13, %s3474_s29  ;;  %p3482_p12 = scmp.lt.u32.totalorder %s3474_s29, %s4115_s12 }
0x116a   : > { %p3476_p7 = pnand %p3475_p4, %p3642_p5 }
0x116b   : > { %p3481_p11 = por %p3480_p10, %p3479_p9 }
0x116c   : > { %p3477_p8 = pneg %p3476_p7 }
0x116d   : > { %p3483_p13 = por %p3482_p12, %p3481_p11 }
0x116f   : > { %p3484_p0 = pnand %p3483_p13, %p3477_p8 }
0x1171   : > { %3487 = shalt.err (!%p3484_p0)
}
0x1172   : > { %s3543_s30 = smov 128   ;;  %s4179_s24 = smov 8  }
0x1173   : > { %3273 = dma.vmem_to_hbm [thread:$0]  (%p3642_p5), %s4118_s22, 512, %s4115_s12, %s4122_s21, %s3543_s30, %s3543_s30, %s4179_s24  }
0x1174 PF: > { %p3279_p1 = scmp.ge.s32.totalorder %s3522_s20, 2  ;;  %s2826_s16 = sand.u32 1, %s3510_s17  }
0x1175   : > { %s2827_s29 = scalar_lea.sflag [#allocation3], %s2826_s16 }
0x1176   : > { %p3276_p2 = pnand %p3279_p1, %p3646_p6 }
0x1178   : > { %3505 = dma.done.wait (!%p3276_p2), %s2827_s29, 512  }
0x1179   : > { %3507 = vsyncadd (!%p3276_p2), %s2827_s29, 4294966784  ;;  %p21_p3 = scmp.ge.s32.totalorder %s3629_s23, 4   ;;  %s4180_s17 = smov %s3514_s18 }
0x117a   : > { %s4181_s18 = smov %s3518_s19  ;;  %s4182_s19 = smov %s3640_s26 }
0x117b   : > { %s4183_s20 = smov %s3629_s23  ;;  %23 = sbr.rel (!%p21_p3) target bundleno = 3 (0x3), region = 99 }
0x1182   :  { %2832 = vsyncpa [#allocation3], 1 }
0x1183   :  { %2834 = vsyncpa [#allocation3 + $0x1], 1 }

</bundles_post_ra>
